<compile_context>
chip_gen: v7x
topology: tpu7x:2x2x1
jax: 0.10.0
libtpu: 0.0.40
codegen_flags: <defaults>
</compile_context>

<pallas_src>
import functools

import numpy as np
import jax
import jax.numpy as jnp
from jax import lax
from jax.experimental import pallas as pl
from jax.experimental.pallas import tpu as pltpu  # noqa: F401  (imported per convention)

_EPS = 1e-5  # PyTorch nn.LayerNorm default eps


def _normalize(t):
    mu = jnp.mean(t, axis=-1, keepdims=True)
    tc = t - mu
    var = jnp.mean(tc * tc, axis=-1, keepdims=True)
    return tc * lax.rsqrt(var + _EPS)


def _layernorm(t, g, b):
    return _normalize(t) * g + b


def _gelu(x):
    # TODO(synk): PyTorch nn.GELU default is exact (erf); tanh approximation used here.
    return jax.nn.gelu(x, approximate=True)


def _token_attention(q, k, v, n_q, n_k, rows, heads, dim_head, S, E, mask):
    """4-token attention, tokens stacked on sublanes, (key-token, head) on lanes.

    q: (n_q*rows, inner), k/v: (n_k*rows, inner); token t occupies rows [t*rows,(t+1)*rows).
    S: (n_k*inner, n_k*heads) block-diag head-sum, E: (n_k*heads, n_k*inner) head-expand.
    mask: (n_q*rows, n_k*heads) additive mask.  Returns (n_q*rows, inner).
    """
    f32 = jnp.float32
    inner = heads * dim_head
    kcat = jnp.concatenate([k[j * rows:(j + 1) * rows] for j in range(n_k)], axis=1)
    vcat = jnp.concatenate([v[j * rows:(j + 1) * rows] for j in range(n_k)], axis=1)
    kfull = jnp.concatenate([kcat] * n_q, axis=0)          # (n_q*rows, n_k*inner)
    vfull = jnp.concatenate([vcat] * n_q, axis=0)
    qfull = jnp.concatenate([q] * n_k, axis=1)              # (n_q*rows, n_k*inner)

    # All pair scores in one multiply + one matmul; lanes = (key token, head).
    scores = jnp.dot(qfull * kfull, S, preferred_element_type=f32) + mask

    sb = [scores[:, j * heads:(j + 1) * heads] for j in range(n_k)]
    m = sb[0]
    for s in sb[1:]:
        m = jnp.maximum(m, s)
    e = jnp.exp(scores - jnp.concatenate([m] * n_k, axis=1))
    den = e[:, :heads]
    for j in range(1, n_k):
        den = den + e[:, j * heads:(j + 1) * heads]
    inv = pl.reciprocal(den, approx=True)                   # EUP, off the VALU path
    w = e * jnp.concatenate([inv] * n_k, axis=1)            # (n_q*rows, n_k*heads)

    # Head-expand all pairs in one matmul, weight * v elementwise, sum over key tokens.
    weighted = jnp.dot(w, E, preferred_element_type=f32) * vfull
    out = weighted[:, :inner]
    for j in range(1, n_k):
        out = out + weighted[:, j * inner:(j + 1) * inner]
    return out


def _pointfusion_kernel(heads, dim_head,
                        x_ref, y_ref, wqkv1_ref, wqkv2_ref, bqkv2_ref,
                        wout1_ref, wm1_ref, wm2_ref, wfus_ref,
                        vecD_ref, vec2D_ref, S_ref, E_ref, mask1_ref, mask2_ref,
                        avg_ref, out_ref):
    f32 = jnp.float32
    x = x_ref[...]                                  # (N, D), N = B*P
    y = y_ref[...]
    N, D = x.shape
    inner = heads * dim_head

    vD = vecD_ref[...]                              # (5, D)
    ln1_g, ln1_b, ln2_g, ln2_b, fus_b = (vD[i:i + 1] for i in range(5))
    v2 = vec2D_ref[...]                             # (7, 2D)
    b_out1, mlp_ln_g, mlp_ln_b, mlp_b1, mlp_b2, fus_ln_g, fus_ln_b = (
        v2[i:i + 1] for i in range(7))
    S = S_ref[...]
    E = E_ref[...]

    # ---- PreNorm(dual) + per-batch avg-pool guidance tokens (one small matmul) ----
    xn = _layernorm(x, ln1_g, ln1_b)
    yn = _layernorm(y, ln2_g, ln2_b)
    g = jnp.dot(avg_ref[...], jnp.concatenate([xn, yn], axis=1),
                preferred_element_type=f32)                         # (N, 2D) = [rg | dg]
    z = jnp.concatenate([xn, yn, g[:, :D], g[:, D:]], axis=0)       # (4N, D) token-stacked

    # ---- attention block 1 (scale folded into wq; to_out_z folded into block 2) ----
    qkv = jnp.dot(z, wqkv1_ref[...], preferred_element_type=f32)    # (4N, 3*inner)
    att1 = _token_attention(qkv[:, :inner], qkv[:, inner:2 * inner], qkv[:, 2 * inner:],
                            4, 4, N, heads, dim_head, S, E, mask1_ref[...])   # (4N, inner)

    # ---- attention block 2: only query tokens 0 (x) and 1 (y) are live ----
    qkv2 = jnp.dot(att1, wqkv2_ref[...], preferred_element_type=f32) + bqkv2_ref[...]
    att2 = _token_attention(qkv2[:2 * N, :inner], qkv2[:, inner:2 * inner],
                            qkv2[:, 2 * inner:],
                            2, 4, N, heads, dim_head, S, E, mask2_ref[...])   # (2N, inner)

    # to_out_z1 for both tokens in one lane-fused (block-diagonal) matmul + residual.
    att2c = jnp.concatenate([att2[:N], att2[N:]], axis=1)            # (N, 2*inner)
    rm = (jnp.concatenate([x, y], axis=1)
          + jnp.dot(att2c, wout1_ref[...], preferred_element_type=f32) + b_out1)  # (N, 2D)

    # ---- both PreNorm-MLP branches fused (per-half LayerNorm statistics) ----
    h = jnp.concatenate([_normalize(rm[:, :D]), _normalize(rm[:, D:])], axis=1)
    h = h * mlp_ln_g + mlp_ln_b
    h = _gelu(jnp.dot(h, wm1_ref[...], preferred_element_type=f32) + mlp_b1)
    mlp = jnp.dot(h, wm2_ref[...], preferred_element_type=f32) + mlp_b2 + rm  # (N,2D)=[mlp_x|mlp_y]

    # ---- fusion head: Linear(LayerNorm(cat(mlp_x, mlp_y))) — cat is already done ----
    fh = _layernorm(mlp, fus_ln_g, fus_ln_b)
    out_ref[...] = jnp.dot(fh, wfus_ref[...], preferred_element_type=f32) + fus_b


def point_fusion_forward(x, y, params, heads, dim_head):
    B, P, D = x.shape
    N = B * P
    inner = heads * dim_head
    scale = dim_head ** (-0.5)
    f32 = jnp.float32

    # Only the last layer's parameters influence the output (the PyTorch loop re-reads
    # the original x, y every iteration; only the last mlp_x/mlp_y reach the fusion head).
    lp = params["layers"][-1]
    fp = params["fusion"]

    def _blockdiag(a, b):
        top = jnp.concatenate([a, jnp.zeros((a.shape[0], b.shape[1]), f32)], axis=1)
        bot = jnp.concatenate([jnp.zeros((b.shape[0], a.shape[1]), f32), b], axis=1)
        return jnp.concatenate([top, bot], axis=0)

    # Fused q/k/v weights; block-2 projections absorb to_out_z (wo_z, bo_z).
    w_qkv1 = jnp.concatenate([lp["wq_z"] * scale, lp["wk_z"], lp["wv_z"]], axis=1)     # (D, 3I)
    w_qkv2_raw = jnp.concatenate([lp["wq_z1"] * scale, lp["wk_z1"], lp["wv_z1"]], axis=1)
    w_qkv2 = jnp.dot(lp["wo_z"], w_qkv2_raw)                                           # (I, 3I)
    b_qkv2 = jnp.dot(lp["bo_z"], w_qkv2_raw)                                           # (1, 3I)

    w_out1 = _blockdiag(lp["wo_z1"], lp["wo_z1"])        # (2I, 2D)
    w_m1 = _blockdiag(lp["m1_w1"], lp["m2_w1"])          # (2D, 2D)
    w_m2 = _blockdiag(lp["m1_w2"], lp["m2_w2"])          # (2D, 2D)
    w_fus = fp["w"]                                      # (2D, D)

    vecD = jnp.concatenate([lp["ln1_g"], lp["ln1_b"], lp["ln2_g"], lp["ln2_b"],
                            fp["b"]], axis=0)            # (5, D)
    vec2D = jnp.concatenate([
        jnp.concatenate([lp["bo_z1"], lp["bo_z1"]], axis=1),
        jnp.concatenate([lp["m1_lng"], lp["m2_lng"]], axis=1),
        jnp.concatenate([lp["m1_lnb"], lp["m2_lnb"]], axis=1),
        jnp.concatenate([lp["m1_b1"], lp["m2_b1"]], axis=1),
        jnp.concatenate([lp["m1_b2"], lp["m2_b2"]], axis=1),
        fp["ln_g"], fp["ln_b"]], axis=0)                 # (7, 2D)

    # Constant routing matrices / masks: built at trace time and passed as INPUTS
    # (fixes the "kernel captures constants" lowering error).
    S_np = np.zeros((4 * inner, 4 * heads), np.float32)   # block-diag head-sum
    E_np = np.zeros((4 * heads, 4 * inner), np.float32)   # block-diag head-expand
    for j in range(4):
        for h in range(heads):
            S_np[j * inner + h * dim_head: j * inner + (h + 1) * dim_head,
                 j * heads + h] = 1.0
            E_np[j * heads + h,
                 j * inner + h * dim_head: j * inner + (h + 1) * dim_head] = 1.0
    mask1_np = np.zeros((4 * N, 4 * heads), np.float32)   # atten_mask  : -100 where i+j==3
    for i in range(4):
        for j in range(4):
            if i + j == 3:
                mask1_np[i * N:(i + 1) * N, j * heads:(j + 1) * heads] = -100.0
    mask2_np = np.zeros((2 * N, 4 * heads), np.float32)   # atten_mask1 rows 0,1
    for i in range(2):
        for j in range(4):
            if (i + j) % 2 == 1:
                mask2_np[i * N:(i + 1) * N, j * heads:(j + 1) * heads] = -100.0
    avg_np = np.kron(np.eye(B, dtype=np.float32),
                     np.full((P, P), 1.0 / P, np.float32)).astype(np.float32)  # (N, N)

    kernel = functools.partial(_pointfusion_kernel, heads, dim_head)
    out = pl.pallas_call(
        kernel,
        out_shape=jax.ShapeDtypeStruct((N, D), f32),
    )(x.reshape(N, D), y.reshape(N, D),
      w_qkv1, w_qkv2, b_qkv2, w_out1, w_m1, w_m2, w_fus, vecD, vec2D,
      jnp.asarray(S_np), jnp.asarray(E_np), jnp.asarray(mask1_np),
      jnp.asarray(mask2_np), jnp.asarray(avg_np))
    return out.reshape(B, P, D)


# ----------------------------------------------------------------------------------
# Pure-JAX reference (faithful transcription of the PyTorch forward, full layer loop)
# ----------------------------------------------------------------------------------
def _reference_forward(x, y, params, heads, dim_head):
    B, P, D = x.shape
    inner = heads * dim_head
    scale = dim_head ** (-0.5)

    def ln(t, g, b):
        mu = jnp.mean(t, axis=-1, keepdims=True)
        var = jnp.mean((t - mu) ** 2, axis=-1, keepdims=True)
        return (t - mu) * lax.rsqrt(var + _EPS) * g + b

    def split(t):   # (B,P,4,inner) -> (B,P,H,4,dh)
        return t.reshape(B, P, 4, heads, dim_head).transpose(0, 1, 3, 2, 4)

    def merge(t):   # (B,P,H,4,dh) -> (B,P,4,inner)
        return t.transpose(0, 1, 3, 2, 4).reshape(B, P, 4, inner)

    mask0 = jnp.array([[0., 0., 0., -100.], [0., 0., -100., 0.],
                       [0., -100., 0., 0.], [-100., 0., 0., 0.]], jnp.float32)
    mask1 = jnp.array([[0., -100., 0., -100.], [-100., 0., -100., 0.],
                       [-100.] * 4, [-100.] * 4], jnp.float32)

    mlp_x = mlp_y = None
    for lp in params["layers"]:
        xn = ln(x, lp["ln1_g"], lp["ln1_b"])
        yn = ln(y, lp["ln2_g"], lp["ln2_b"])
        rg = jnp.broadcast_to(jnp.mean(xn, axis=1, keepdims=True), xn.shape)
        dg = jnp.broadcast_to(jnp.mean(yn, axis=1, keepdims=True), yn.shape)
        z = jnp.stack([xn, yn, rg, dg], axis=2)                      # (B,P,4,D)

        q, k, v = (split(z @ lp[w]) for w in ("wq_z", "wk_z", "wv_z"))
        dots = jnp.einsum('bphid,bphjd->bphij', q, k) * scale + mask0
        attn = jax.nn.softmax(dots, axis=-1)
        zo = merge(jnp.einsum('bphij,bphjd->bphid', attn, v)) @ lp["wo_z"] + lp["bo_z"]

        q1, k1, v1 = (split(zo @ lp[w]) for w in ("wq_z1", "wk_z1", "wv_z1"))
        dots1 = jnp.einsum('bphid,bphjd->bphij', q1, k1) * scale + mask1
        attn1 = jax.nn.softmax(dots1, axis=-1)
        zo1 = merge(jnp.einsum('bphij,bphjd->bphid', attn1, v1)) @ lp["wo_z1"] + lp["bo_z1"]

        rm_x, rm_y = x + zo1[:, :, 0, :], y + zo1[:, :, 1, :]
        hx = _gelu(ln(rm_x, lp["m1_lng"], lp["m1_lnb"]) @ lp["m1_w1"] + lp["m1_b1"])
        mlp_x = hx @ lp["m1_w2"] + lp["m1_b2"] + rm_x
        hy = _gelu(ln(rm_y, lp["m2_lng"], lp["m2_lnb"]) @ lp["m2_w1"] + lp["m2_b1"])
        mlp_y = hy @ lp["m2_w2"] + lp["m2_b2"] + rm_y

    fp = params["fusion"]
    cat = jnp.concatenate([mlp_x, mlp_y], axis=-1)
    return ln(cat, fp["ln_g"], fp["ln_b"]) @ fp["w"] + fp["b"]


def init_params(key, dim, depth, heads, dim_head):
    inner = heads * dim_head
    assert not (heads == 1 and dim_head == dim), "only the project_out=True path is implemented"

    def dense(k, shape, s=0.05):
        return (s * jax.random.normal(k, shape)).astype(jnp.float32)

    ones = lambda n: jnp.ones((1, n), jnp.float32)
    zeros = lambda n: jnp.zeros((1, n), jnp.float32)

    keys = jax.random.split(key, depth + 1)
    layers = []
    for li in range(depth):
        ks = jax.random.split(keys[li], 12)
        layers.append(dict(
            ln1_g=ones(dim), ln1_b=zeros(dim),
            ln2_g=ones(dim), ln2_b=zeros(dim),
            wq_z=dense(ks[0], (dim, inner)), wk_z=dense(ks[1], (dim, inner)),
            wv_z=dense(ks[2], (dim, inner)),
            wo_z=dense(ks[3], (inner, dim)), bo_z=zeros(dim),
            wq_z1=dense(ks[4], (dim, inner)), wk_z1=dense(ks[5], (dim, inner)),
            wv_z1=dense(ks[6], (dim, inner)),
            wo_z1=dense(ks[7], (inner, dim)), bo_z1=zeros(dim),
            m1_lng=ones(dim), m1_lnb=zeros(dim),
            m1_w1=dense(ks[8], (dim, dim)), m1_b1=zeros(dim),
            m1_w2=dense(ks[9], (dim, dim)), m1_b2=zeros(dim),
            m2_lng=ones(dim), m2_lnb=zeros(dim),
            m2_w1=dense(ks[10], (dim, dim)), m2_b1=zeros(dim),
            m2_w2=dense(ks[11], (dim, dim)), m2_b2=zeros(dim),
        ))
    fk = jax.random.split(keys[depth], 1)[0]
    fusion = dict(ln_g=ones(2 * dim), ln_b=zeros(2 * dim),
                  w=dense(fk, (2 * dim, dim)), b=zeros(dim))
    return {"layers": layers, "fusion": fusion}


if __name__ == "__main__":
    B, P, D = 2, 8, 32          # batch, points, feature dim
    heads, dim_head, depth = 4, 8, 2

    key = jax.random.PRNGKey(0)
    kx, ky, kp = jax.random.split(key, 3)
    x = jax.random.normal(kx, (B, P, D), dtype=jnp.float32)
    y = jax.random.normal(ky, (B, P, D), dtype=jnp.float32)
    params = init_params(kp, D, depth, heads, dim_head)

    out = point_fusion_forward(x, y, params, heads, dim_head)
    out = jax.block_until_ready(out)
    assert out.shape == (B, P, D)
    assert bool(jnp.all(jnp.isfinite(out)))

    ref = _reference_forward(x, y, params, heads, dim_head)
    assert bool(jnp.allclose(out, ref, atol=5e-2, rtol=5e-2)), \
        float(jnp.max(jnp.abs(out - ref)))
    print("KERNEL_OK")
</pallas_src>

<mosaic_0001>
module attributes {stable_mosaic.version = 11 : i64} {
  func.func @_pointfusion_kernel(%arg0: memref<16x32xf32, #tpu.memory_space<vmem>>, %arg1: memref<16x32xf32, #tpu.memory_space<vmem>>, %arg2: memref<32x96xf32, #tpu.memory_space<vmem>>, %arg3: memref<32x96xf32, #tpu.memory_space<vmem>>, %arg4: memref<1x96xf32, #tpu.memory_space<vmem>>, %arg5: memref<64x64xf32, #tpu.memory_space<vmem>>, %arg6: memref<64x64xf32, #tpu.memory_space<vmem>>, %arg7: memref<64x64xf32, #tpu.memory_space<vmem>>, %arg8: memref<64x32xf32, #tpu.memory_space<vmem>>, %arg9: memref<5x32xf32, #tpu.memory_space<vmem>>, %arg10: memref<7x64xf32, #tpu.memory_space<vmem>>, %arg11: memref<128x16xf32, #tpu.memory_space<vmem>>, %arg12: memref<16x128xf32, #tpu.memory_space<vmem>>, %arg13: memref<64x16xf32, #tpu.memory_space<vmem>>, %arg14: memref<32x16xf32, #tpu.memory_space<vmem>>, %arg15: memref<16x16xf32, #tpu.memory_space<vmem>>, %arg16: memref<16x32xf32, #tpu.memory_space<vmem>>) attributes {dimension_semantics = [], scalar_prefetch = 0 : i64, scratch_operands = 0 : i64, tpu.core_type = #tpu.core_type<tc>} {
    %c0 = arith.constant 0 : index
    %c0_0 = arith.constant 0 : index
    %0 = vector.load %arg0[%c0, %c0_0] : memref<16x32xf32, #tpu.memory_space<vmem>>, vector<16x32xf32>
    %c0_1 = arith.constant 0 : index
    %c0_2 = arith.constant 0 : index
    %1 = vector.load %arg1[%c0_1, %c0_2] : memref<16x32xf32, #tpu.memory_space<vmem>>, vector<16x32xf32>
    %c0_3 = arith.constant 0 : index
    %c0_4 = arith.constant 0 : index
    %2 = vector.load %arg9[%c0_3, %c0_4] : memref<5x32xf32, #tpu.memory_space<vmem>>, vector<5x32xf32>
    %3 = vector.extract_strided_slice %2 {offsets = [0, 0], sizes = [1, 32], strides = [1, 1]} : vector<5x32xf32> to vector<1x32xf32>
    %4 = vector.extract_strided_slice %2 {offsets = [1, 0], sizes = [1, 32], strides = [1, 1]} : vector<5x32xf32> to vector<1x32xf32>
    %5 = vector.extract_strided_slice %2 {offsets = [2, 0], sizes = [1, 32], strides = [1, 1]} : vector<5x32xf32> to vector<1x32xf32>
    %6 = vector.extract_strided_slice %2 {offsets = [3, 0], sizes = [1, 32], strides = [1, 1]} : vector<5x32xf32> to vector<1x32xf32>
    %7 = vector.extract_strided_slice %2 {offsets = [4, 0], sizes = [1, 32], strides = [1, 1]} : vector<5x32xf32> to vector<1x32xf32>
    %c0_5 = arith.constant 0 : index
    %c0_6 = arith.constant 0 : index
    %8 = vector.load %arg10[%c0_5, %c0_6] : memref<7x64xf32, #tpu.memory_space<vmem>>, vector<7x64xf32>
    %9 = vector.extract_strided_slice %8 {offsets = [0, 0], sizes = [1, 64], strides = [1, 1]} : vector<7x64xf32> to vector<1x64xf32>
    %10 = vector.extract_strided_slice %8 {offsets = [1, 0], sizes = [1, 64], strides = [1, 1]} : vector<7x64xf32> to vector<1x64xf32>
    %11 = vector.extract_strided_slice %8 {offsets = [2, 0], sizes = [1, 64], strides = [1, 1]} : vector<7x64xf32> to vector<1x64xf32>
    %12 = vector.extract_strided_slice %8 {offsets = [3, 0], sizes = [1, 64], strides = [1, 1]} : vector<7x64xf32> to vector<1x64xf32>
    %13 = vector.extract_strided_slice %8 {offsets = [4, 0], sizes = [1, 64], strides = [1, 1]} : vector<7x64xf32> to vector<1x64xf32>
    %14 = vector.extract_strided_slice %8 {offsets = [5, 0], sizes = [1, 64], strides = [1, 1]} : vector<7x64xf32> to vector<1x64xf32>
    %15 = vector.extract_strided_slice %8 {offsets = [6, 0], sizes = [1, 64], strides = [1, 1]} : vector<7x64xf32> to vector<1x64xf32>
    %c0_7 = arith.constant 0 : index
    %c0_8 = arith.constant 0 : index
    %16 = vector.load %arg11[%c0_7, %c0_8] : memref<128x16xf32, #tpu.memory_space<vmem>>, vector<128x16xf32>
    %c0_9 = arith.constant 0 : index
    %c0_10 = arith.constant 0 : index
    %17 = vector.load %arg12[%c0_9, %c0_10] : memref<16x128xf32, #tpu.memory_space<vmem>>, vector<16x128xf32>
    %cst = arith.constant dense<0.000000e+00> : vector<16xf32>
    %18 = vector.multi_reduction <add>, %0, %cst [1] : vector<16x32xf32> to vector<16xf32>
    %19 = vector.shape_cast %18 : vector<16xf32> to vector<16x1xf32>
    %cst_11 = arith.constant 3.200000e+01 : f32
    %20 = vector.broadcast %cst_11 : f32 to vector<16x1xf32>
    %21 = arith.divf %19, %20 : vector<16x1xf32>
    %22 = vector.broadcast %21 : vector<16x1xf32> to vector<16x32xf32>
    %23 = arith.subf %0, %22 : vector<16x32xf32>
    %24 = arith.mulf %23, %23 : vector<16x32xf32>
    %cst_12 = arith.constant dense<0.000000e+00> : vector<16xf32>
    %25 = vector.multi_reduction <add>, %24, %cst_12 [1] : vector<16x32xf32> to vector<16xf32>
    %26 = vector.shape_cast %25 : vector<16xf32> to vector<16x1xf32>
    %cst_13 = arith.constant 3.200000e+01 : f32
    %27 = vector.broadcast %cst_13 : f32 to vector<16x1xf32>
    %28 = arith.divf %26, %27 : vector<16x1xf32>
    %cst_14 = arith.constant 9.99999974E-6 : f32
    %29 = vector.broadcast %cst_14 : f32 to vector<16x1xf32>
    %30 = arith.addf %28, %29 : vector<16x1xf32>
    %31 = math.rsqrt %30 : vector<16x1xf32>
    %32 = vector.broadcast %31 : vector<16x1xf32> to vector<16x32xf32>
    %33 = arith.mulf %23, %32 : vector<16x32xf32>
    %34 = vector.broadcast %3 : vector<1x32xf32> to vector<16x32xf32>
    %35 = arith.mulf %33, %34 : vector<16x32xf32>
    %36 = vector.broadcast %4 : vector<1x32xf32> to vector<16x32xf32>
    %37 = arith.addf %35, %36 : vector<16x32xf32>
    %cst_15 = arith.constant dense<0.000000e+00> : vector<16xf32>
    %38 = vector.multi_reduction <add>, %1, %cst_15 [1] : vector<16x32xf32> to vector<16xf32>
    %39 = vector.shape_cast %38 : vector<16xf32> to vector<16x1xf32>
    %cst_16 = arith.constant 3.200000e+01 : f32
    %40 = vector.broadcast %cst_16 : f32 to vector<16x1xf32>
    %41 = arith.divf %39, %40 : vector<16x1xf32>
    %42 = vector.broadcast %41 : vector<16x1xf32> to vector<16x32xf32>
    %43 = arith.subf %1, %42 : vector<16x32xf32>
    %44 = arith.mulf %43, %43 : vector<16x32xf32>
    %cst_17 = arith.constant dense<0.000000e+00> : vector<16xf32>
    %45 = vector.multi_reduction <add>, %44, %cst_17 [1] : vector<16x32xf32> to vector<16xf32>
    %46 = vector.shape_cast %45 : vector<16xf32> to vector<16x1xf32>
    %cst_18 = arith.constant 3.200000e+01 : f32
    %47 = vector.broadcast %cst_18 : f32 to vector<16x1xf32>
    %48 = arith.divf %46, %47 : vector<16x1xf32>
    %cst_19 = arith.constant 9.99999974E-6 : f32
    %49 = vector.broadcast %cst_19 : f32 to vector<16x1xf32>
    %50 = arith.addf %48, %49 : vector<16x1xf32>
    %51 = math.rsqrt %50 : vector<16x1xf32>
    %52 = vector.broadcast %51 : vector<16x1xf32> to vector<16x32xf32>
    %53 = arith.mulf %43, %52 : vector<16x32xf32>
    %54 = vector.broadcast %5 : vector<1x32xf32> to vector<16x32xf32>
    %55 = arith.mulf %53, %54 : vector<16x32xf32>
    %56 = vector.broadcast %6 : vector<1x32xf32> to vector<16x32xf32>
    %57 = arith.addf %55, %56 : vector<16x32xf32>
    %c0_20 = arith.constant 0 : index
    %c0_21 = arith.constant 0 : index
    %58 = vector.load %arg15[%c0_20, %c0_21] : memref<16x16xf32, #tpu.memory_space<vmem>>, vector<16x16xf32>
    %59 = tpu.concatenate %37, %57 in 1 : vector<16x32xf32>, vector<16x32xf32> -> vector<16x64xf32>
    %cst_22 = arith.constant dense<0.000000e+00> : vector<16x64xf32>
    %60 = tpu.matmul %58, %59, %cst_22 {dimension_numbers = #tpu.dot_dimension_numbers<[1], [0], [0], [1], [0, 0, 1, 1], [], []>} : vector<16x16xf32>, vector<16x64xf32>, vector<16x64xf32> -> vector<16x64xf32>
    %61 = vector.extract_strided_slice %60 {offsets = [0, 0], sizes = [16, 32], strides = [1, 1]} : vector<16x64xf32> to vector<16x32xf32>
    %62 = vector.extract_strided_slice %60 {offsets = [0, 32], sizes = [16, 32], strides = [1, 1]} : vector<16x64xf32> to vector<16x32xf32>
    %63 = tpu.concatenate %37, %57, %61, %62 in 0 : vector<16x32xf32>, vector<16x32xf32>, vector<16x32xf32>, vector<16x32xf32> -> vector<64x32xf32>
    %c0_23 = arith.constant 0 : index
    %c0_24 = arith.constant 0 : index
    %64 = vector.load %arg2[%c0_23, %c0_24] : memref<32x96xf32, #tpu.memory_space<vmem>>, vector<32x96xf32>
    %cst_25 = arith.constant dense<0.000000e+00> : vector<64x96xf32>
    %65 = tpu.matmul %63, %64, %cst_25 {dimension_numbers = #tpu.dot_dimension_numbers<[1], [0], [0], [1], [0, 0, 1, 1], [], []>} : vector<64x32xf32>, vector<32x96xf32>, vector<64x96xf32> -> vector<64x96xf32>
    %66 = vector.extract_strided_slice %65 {offsets = [0, 0], sizes = [64, 32], strides = [1, 1]} : vector<64x96xf32> to vector<64x32xf32>
    %67 = vector.extract_strided_slice %65 {offsets = [0, 32], sizes = [64, 32], strides = [1, 1]} : vector<64x96xf32> to vector<64x32xf32>
    %68 = vector.extract_strided_slice %65 {offsets = [0, 64], sizes = [64, 32], strides = [1, 1]} : vector<64x96xf32> to vector<64x32xf32>
    %c0_26 = arith.constant 0 : index
    %c0_27 = arith.constant 0 : index
    %69 = vector.load %arg13[%c0_26, %c0_27] : memref<64x16xf32, #tpu.memory_space<vmem>>, vector<64x16xf32>
    %70 = vector.extract_strided_slice %67 {offsets = [0, 0], sizes = [16, 32], strides = [1, 1]} : vector<64x32xf32> to vector<16x32xf32>
    %71 = vector.extract_strided_slice %67 {offsets = [16, 0], sizes = [16, 32], strides = [1, 1]} : vector<64x32xf32> to vector<16x32xf32>
    %72 = vector.extract_strided_slice %67 {offsets = [32, 0], sizes = [16, 32], strides = [1, 1]} : vector<64x32xf32> to vector<16x32xf32>
    %73 = vector.extract_strided_slice %67 {offsets = [48, 0], sizes = [16, 32], strides = [1, 1]} : vector<64x32xf32> to vector<16x32xf32>
    %74 = tpu.concatenate %70, %71, %72, %73 in 1 : vector<16x32xf32>, vector<16x32xf32>, vector<16x32xf32>, vector<16x32xf32> -> vector<16x128xf32>
    %75 = vector.extract_strided_slice %68 {offsets = [0, 0], sizes = [16, 32], strides = [1, 1]} : vector<64x32xf32> to vector<16x32xf32>
    %76 = vector.extract_strided_slice %68 {offsets = [16, 0], sizes = [16, 32], strides = [1, 1]} : vector<64x32xf32> to vector<16x32xf32>
    %77 = vector.extract_strided_slice %68 {offsets = [32, 0], sizes = [16, 32], strides = [1, 1]} : vector<64x32xf32> to vector<16x32xf32>
    %78 = vector.extract_strided_slice %68 {offsets = [48, 0], sizes = [16, 32], strides = [1, 1]} : vector<64x32xf32> to vector<16x32xf32>
    %79 = tpu.concatenate %75, %76, %77, %78 in 1 : vector<16x32xf32>, vector<16x32xf32>, vector<16x32xf32>, vector<16x32xf32> -> vector<16x128xf32>
    %80 = tpu.concatenate %74, %74, %74, %74 in 0 : vector<16x128xf32>, vector<16x128xf32>, vector<16x128xf32>, vector<16x128xf32> -> vector<64x128xf32>
    %81 = tpu.concatenate %79, %79, %79, %79 in 0 : vector<16x128xf32>, vector<16x128xf32>, vector<16x128xf32>, vector<16x128xf32> -> vector<64x128xf32>
    %82 = tpu.concatenate %66, %66, %66, %66 in 1 : vector<64x32xf32>, vector<64x32xf32>, vector<64x32xf32>, vector<64x32xf32> -> vector<64x128xf32>
    %83 = arith.mulf %82, %80 : vector<64x128xf32>
    %cst_28 = arith.constant dense<0.000000e+00> : vector<64x16xf32>
    %84 = tpu.matmul %83, %16, %cst_28 {dimension_numbers = #tpu.dot_dimension_numbers<[1], [0], [0], [1], [0, 0, 1, 1], [], []>} : vector<64x128xf32>, vector<128x16xf32>, vector<64x16xf32> -> vector<64x16xf32>
    %85 = arith.addf %84, %69 : vector<64x16xf32>
    %86 = vector.extract_strided_slice %85 {offsets = [0, 0], sizes = [64, 4], strides = [1, 1]} : vector<64x16xf32> to vector<64x4xf32>
    %87 = vector.extract_strided_slice %85 {offsets = [0, 4], sizes = [64, 4], strides = [1, 1]} : vector<64x16xf32> to vector<64x4xf32>
    %88 = vector.extract_strided_slice %85 {offsets = [0, 8], sizes = [64, 4], strides = [1, 1]} : vector<64x16xf32> to vector<64x4xf32>
    %89 = vector.extract_strided_slice %85 {offsets = [0, 12], sizes = [64, 4], strides = [1, 1]} : vector<64x16xf32> to vector<64x4xf32>
    %90 = arith.maximumf %86, %87 : vector<64x4xf32>
    %91 = arith.maximumf %90, %88 : vector<64x4xf32>
    %92 = arith.maximumf %91, %89 : vector<64x4xf32>
    %93 = tpu.concatenate %92, %92, %92, %92 in 1 : vector<64x4xf32>, vector<64x4xf32>, vector<64x4xf32>, vector<64x4xf32> -> vector<64x16xf32>
    %94 = arith.subf %85, %93 : vector<64x16xf32>
    %95 = math.exp %94 : vector<64x16xf32>
    %96 = vector.extract_strided_slice %95 {offsets = [0, 0], sizes = [64, 4], strides = [1, 1]} : vector<64x16xf32> to vector<64x4xf32>
    %97 = vector.extract_strided_slice %95 {offsets = [0, 4], sizes = [64, 4], strides = [1, 1]} : vector<64x16xf32> to vector<64x4xf32>
    %98 = arith.addf %96, %97 : vector<64x4xf32>
    %99 = vector.extract_strided_slice %95 {offsets = [0, 8], sizes = [64, 4], strides = [1, 1]} : vector<64x16xf32> to vector<64x4xf32>
    %100 = arith.addf %98, %99 : vector<64x4xf32>
    %101 = vector.extract_strided_slice %95 {offsets = [0, 12], sizes = [64, 4], strides = [1, 1]} : vector<64x16xf32> to vector<64x4xf32>
    %102 = arith.addf %100, %101 : vector<64x4xf32>
    %103 = tpu.reciprocal %102 {approx = true} : vector<64x4xf32> -> vector<64x4xf32>
    %104 = tpu.concatenate %103, %103, %103, %103 in 1 : vector<64x4xf32>, vector<64x4xf32>, vector<64x4xf32>, vector<64x4xf32> -> vector<64x16xf32>
    %105 = arith.mulf %95, %104 : vector<64x16xf32>
    %cst_29 = arith.constant dense<0.000000e+00> : vector<64x128xf32>
    %106 = tpu.matmul %105, %17, %cst_29 {dimension_numbers = #tpu.dot_dimension_numbers<[1], [0], [0], [1], [0, 0, 1, 1], [], []>} : vector<64x16xf32>, vector<16x128xf32>, vector<64x128xf32> -> vector<64x128xf32>
    %107 = arith.mulf %106, %81 : vector<64x128xf32>
    %108 = vector.extract_strided_slice %107 {offsets = [0, 0], sizes = [64, 32], strides = [1, 1]} : vector<64x128xf32> to vector<64x32xf32>
    %109 = vector.extract_strided_slice %107 {offsets = [0, 32], sizes = [64, 32], strides = [1, 1]} : vector<64x128xf32> to vector<64x32xf32>
    %110 = arith.addf %108, %109 : vector<64x32xf32>
    %111 = vector.extract_strided_slice %107 {offsets = [0, 64], sizes = [64, 32], strides = [1, 1]} : vector<64x128xf32> to vector<64x32xf32>
    %112 = arith.addf %110, %111 : vector<64x32xf32>
    %113 = vector.extract_strided_slice %107 {offsets = [0, 96], sizes = [64, 32], strides = [1, 1]} : vector<64x128xf32> to vector<64x32xf32>
    %114 = arith.addf %112, %113 : vector<64x32xf32>
    %c0_30 = arith.constant 0 : index
    %c0_31 = arith.constant 0 : index
    %115 = vector.load %arg3[%c0_30, %c0_31] : memref<32x96xf32, #tpu.memory_space<vmem>>, vector<32x96xf32>
    %cst_32 = arith.constant dense<0.000000e+00> : vector<64x96xf32>
    %116 = tpu.matmul %114, %115, %cst_32 {dimension_numbers = #tpu.dot_dimension_numbers<[1], [0], [0], [1], [0, 0, 1, 1], [], []>} : vector<64x32xf32>, vector<32x96xf32>, vector<64x96xf32> -> vector<64x96xf32>
    %c0_33 = arith.constant 0 : index
    %c0_34 = arith.constant 0 : index
    %117 = vector.load %arg4[%c0_33, %c0_34] : memref<1x96xf32, #tpu.memory_space<vmem>>, vector<1x96xf32>
    %118 = vector.broadcast %117 : vector<1x96xf32> to vector<64x96xf32>
    %119 = arith.addf %116, %118 : vector<64x96xf32>
    %120 = vector.extract_strided_slice %119 {offsets = [0, 0], sizes = [32, 32], strides = [1, 1]} : vector<64x96xf32> to vector<32x32xf32>
    %121 = vector.extract_strided_slice %119 {offsets = [0, 32], sizes = [64, 32], strides = [1, 1]} : vector<64x96xf32> to vector<64x32xf32>
    %122 = vector.extract_strided_slice %119 {offsets = [0, 64], sizes = [64, 32], strides = [1, 1]} : vector<64x96xf32> to vector<64x32xf32>
    %c0_35 = arith.constant 0 : index
    %c0_36 = arith.constant 0 : index
    %123 = vector.load %arg14[%c0_35, %c0_36] : memref<32x16xf32, #tpu.memory_space<vmem>>, vector<32x16xf32>
    %124 = vector.extract_strided_slice %121 {offsets = [0, 0], sizes = [16, 32], strides = [1, 1]} : vector<64x32xf32> to vector<16x32xf32>
    %125 = vector.extract_strided_slice %121 {offsets = [16, 0], sizes = [16, 32], strides = [1, 1]} : vector<64x32xf32> to vector<16x32xf32>
    %126 = vector.extract_strided_slice %121 {offsets = [32, 0], sizes = [16, 32], strides = [1, 1]} : vector<64x32xf32> to vector<16x32xf32>
    %127 = vector.extract_strided_slice %121 {offsets = [48, 0], sizes = [16, 32], strides = [1, 1]} : vector<64x32xf32> to vector<16x32xf32>
    %128 = tpu.concatenate %124, %125, %126, %127 in 1 : vector<16x32xf32>, vector<16x32xf32>, vector<16x32xf32>, vector<16x32xf32> -> vector<16x128xf32>
    %129 = vector.extract_strided_slice %122 {offsets = [0, 0], sizes = [16, 32], strides = [1, 1]} : vector<64x32xf32> to vector<16x32xf32>
    %130 = vector.extract_strided_slice %122 {offsets = [16, 0], sizes = [16, 32], strides = [1, 1]} : vector<64x32xf32> to vector<16x32xf32>
    %131 = vector.extract_strided_slice %122 {offsets = [32, 0], sizes = [16, 32], strides = [1, 1]} : vector<64x32xf32> to vector<16x32xf32>
    %132 = vector.extract_strided_slice %122 {offsets = [48, 0], sizes = [16, 32], strides = [1, 1]} : vector<64x32xf32> to vector<16x32xf32>
    %133 = tpu.concatenate %129, %130, %131, %132 in 1 : vector<16x32xf32>, vector<16x32xf32>, vector<16x32xf32>, vector<16x32xf32> -> vector<16x128xf32>
    %134 = tpu.concatenate %128, %128 in 0 : vector<16x128xf32>, vector<16x128xf32> -> vector<32x128xf32>
    %135 = tpu.concatenate %133, %133 in 0 : vector<16x128xf32>, vector<16x128xf32> -> vector<32x128xf32>
    %136 = tpu.concatenate %120, %120, %120, %120 in 1 : vector<32x32xf32>, vector<32x32xf32>, vector<32x32xf32>, vector<32x32xf32> -> vector<32x128xf32>
    %137 = arith.mulf %136, %134 : vector<32x128xf32>
    %cst_37 = arith.constant dense<0.000000e+00> : vector<32x16xf32>
    %138 = tpu.matmul %137, %16, %cst_37 {dimension_numbers = #tpu.dot_dimension_numbers<[1], [0], [0], [1], [0, 0, 1, 1], [], []>} : vector<32x128xf32>, vector<128x16xf32>, vector<32x16xf32> -> vector<32x16xf32>
    %139 = arith.addf %138, %123 : vector<32x16xf32>
    %140 = vector.extract_strided_slice %139 {offsets = [0, 0], sizes = [32, 4], strides = [1, 1]} : vector<32x16xf32> to vector<32x4xf32>
    %141 = vector.extract_strided_slice %139 {offsets = [0, 4], sizes = [32, 4], strides = [1, 1]} : vector<32x16xf32> to vector<32x4xf32>
    %142 = vector.extract_strided_slice %139 {offsets = [0, 8], sizes = [32, 4], strides = [1, 1]} : vector<32x16xf32> to vector<32x4xf32>
    %143 = vector.extract_strided_slice %139 {offsets = [0, 12], sizes = [32, 4], strides = [1, 1]} : vector<32x16xf32> to vector<32x4xf32>
    %144 = arith.maximumf %140, %141 : vector<32x4xf32>
    %145 = arith.maximumf %144, %142 : vector<32x4xf32>
    %146 = arith.maximumf %145, %143 : vector<32x4xf32>
    %147 = tpu.concatenate %146, %146, %146, %146 in 1 : vector<32x4xf32>, vector<32x4xf32>, vector<32x4xf32>, vector<32x4xf32> -> vector<32x16xf32>
    %148 = arith.subf %139, %147 : vector<32x16xf32>
    %149 = math.exp %148 : vector<32x16xf32>
    %150 = vector.extract_strided_slice %149 {offsets = [0, 0], sizes = [32, 4], strides = [1, 1]} : vector<32x16xf32> to vector<32x4xf32>
    %151 = vector.extract_strided_slice %149 {offsets = [0, 4], sizes = [32, 4], strides = [1, 1]} : vector<32x16xf32> to vector<32x4xf32>
    %152 = arith.addf %150, %151 : vector<32x4xf32>
    %153 = vector.extract_strided_slice %149 {offsets = [0, 8], sizes = [32, 4], strides = [1, 1]} : vector<32x16xf32> to vector<32x4xf32>
    %154 = arith.addf %152, %153 : vector<32x4xf32>
    %155 = vector.extract_strided_slice %149 {offsets = [0, 12], sizes = [32, 4], strides = [1, 1]} : vector<32x16xf32> to vector<32x4xf32>
    %156 = arith.addf %154, %155 : vector<32x4xf32>
    %157 = tpu.reciprocal %156 {approx = true} : vector<32x4xf32> -> vector<32x4xf32>
    %158 = tpu.concatenate %157, %157, %157, %157 in 1 : vector<32x4xf32>, vector<32x4xf32>, vector<32x4xf32>, vector<32x4xf32> -> vector<32x16xf32>
    %159 = arith.mulf %149, %158 : vector<32x16xf32>
    %cst_38 = arith.constant dense<0.000000e+00> : vector<32x128xf32>
    %160 = tpu.matmul %159, %17, %cst_38 {dimension_numbers = #tpu.dot_dimension_numbers<[1], [0], [0], [1], [0, 0, 1, 1], [], []>} : vector<32x16xf32>, vector<16x128xf32>, vector<32x128xf32> -> vector<32x128xf32>
    %161 = arith.mulf %160, %135 : vector<32x128xf32>
    %162 = vector.extract_strided_slice %161 {offsets = [0, 0], sizes = [32, 32], strides = [1, 1]} : vector<32x128xf32> to vector<32x32xf32>
    %163 = vector.extract_strided_slice %161 {offsets = [0, 32], sizes = [32, 32], strides = [1, 1]} : vector<32x128xf32> to vector<32x32xf32>
    %164 = arith.addf %162, %163 : vector<32x32xf32>
    %165 = vector.extract_strided_slice %161 {offsets = [0, 64], sizes = [32, 32], strides = [1, 1]} : vector<32x128xf32> to vector<32x32xf32>
    %166 = arith.addf %164, %165 : vector<32x32xf32>
    %167 = vector.extract_strided_slice %161 {offsets = [0, 96], sizes = [32, 32], strides = [1, 1]} : vector<32x128xf32> to vector<32x32xf32>
    %168 = arith.addf %166, %167 : vector<32x32xf32>
    %169 = vector.extract_strided_slice %168 {offsets = [0, 0], sizes = [16, 32], strides = [1, 1]} : vector<32x32xf32> to vector<16x32xf32>
    %170 = vector.extract_strided_slice %168 {offsets = [16, 0], sizes = [16, 32], strides = [1, 1]} : vector<32x32xf32> to vector<16x32xf32>
    %171 = tpu.concatenate %169, %170 in 1 : vector<16x32xf32>, vector<16x32xf32> -> vector<16x64xf32>
    %172 = tpu.concatenate %0, %1 in 1 : vector<16x32xf32>, vector<16x32xf32> -> vector<16x64xf32>
    %c0_39 = arith.constant 0 : index
    %c0_40 = arith.constant 0 : index
    %173 = vector.load %arg5[%c0_39, %c0_40] : memref<64x64xf32, #tpu.memory_space<vmem>>, vector<64x64xf32>
    %cst_41 = arith.constant dense<0.000000e+00> : vector<16x64xf32>
    %174 = tpu.matmul %171, %173, %cst_41 {dimension_numbers = #tpu.dot_dimension_numbers<[1], [0], [0], [1], [0, 0, 1, 1], [], []>} : vector<16x64xf32>, vector<64x64xf32>, vector<16x64xf32> -> vector<16x64xf32>
    %175 = arith.addf %172, %174 : vector<16x64xf32>
    %176 = vector.broadcast %9 : vector<1x64xf32> to vector<16x64xf32>
    %177 = arith.addf %175, %176 : vector<16x64xf32>
    %178 = vector.extract_strided_slice %177 {offsets = [0, 0], sizes = [16, 32], strides = [1, 1]} : vector<16x64xf32> to vector<16x32xf32>
    %cst_42 = arith.constant dense<0.000000e+00> : vector<16xf32>
    %179 = vector.multi_reduction <add>, %178, %cst_42 [1] : vector<16x32xf32> to vector<16xf32>
    %180 = vector.shape_cast %179 : vector<16xf32> to vector<16x1xf32>
    %cst_43 = arith.constant 3.200000e+01 : f32
    %181 = vector.broadcast %cst_43 : f32 to vector<16x1xf32>
    %182 = arith.divf %180, %181 : vector<16x1xf32>
    %183 = vector.broadcast %182 : vector<16x1xf32> to vector<16x32xf32>
    %184 = arith.subf %178, %183 : vector<16x32xf32>
    %185 = arith.mulf %184, %184 : vector<16x32xf32>
    %cst_44 = arith.constant dense<0.000000e+00> : vector<16xf32>
    %186 = vector.multi_reduction <add>, %185, %cst_44 [1] : vector<16x32xf32> to vector<16xf32>
    %187 = vector.shape_cast %186 : vector<16xf32> to vector<16x1xf32>
    %cst_45 = arith.constant 3.200000e+01 : f32
    %188 = vector.broadcast %cst_45 : f32 to vector<16x1xf32>
    %189 = arith.divf %187, %188 : vector<16x1xf32>
    %cst_46 = arith.constant 9.99999974E-6 : f32
    %190 = vector.broadcast %cst_46 : f32 to vector<16x1xf32>
    %191 = arith.addf %189, %190 : vector<16x1xf32>
    %192 = math.rsqrt %191 : vector<16x1xf32>
    %193 = vector.broadcast %192 : vector<16x1xf32> to vector<16x32xf32>
    %194 = arith.mulf %184, %193 : vector<16x32xf32>
    %195 = vector.extract_strided_slice %177 {offsets = [0, 32], sizes = [16, 32], strides = [1, 1]} : vector<16x64xf32> to vector<16x32xf32>
    %cst_47 = arith.constant dense<0.000000e+00> : vector<16xf32>
    %196 = vector.multi_reduction <add>, %195, %cst_47 [1] : vector<16x32xf32> to vector<16xf32>
    %197 = vector.shape_cast %196 : vector<16xf32> to vector<16x1xf32>
    %cst_48 = arith.constant 3.200000e+01 : f32
    %198 = vector.broadcast %cst_48 : f32 to vector<16x1xf32>
    %199 = arith.divf %197, %198 : vector<16x1xf32>
    %200 = vector.broadcast %199 : vector<16x1xf32> to vector<16x32xf32>
    %201 = arith.subf %195, %200 : vector<16x32xf32>
    %202 = arith.mulf %201, %201 : vector<16x32xf32>
    %cst_49 = arith.constant dense<0.000000e+00> : vector<16xf32>
    %203 = vector.multi_reduction <add>, %202, %cst_49 [1] : vector<16x32xf32> to vector<16xf32>
    %204 = vector.shape_cast %203 : vector<16xf32> to vector<16x1xf32>
    %cst_50 = arith.constant 3.200000e+01 : f32
    %205 = vector.broadcast %cst_50 : f32 to vector<16x1xf32>
    %206 = arith.divf %204, %205 : vector<16x1xf32>
    %cst_51 = arith.constant 9.99999974E-6 : f32
    %207 = vector.broadcast %cst_51 : f32 to vector<16x1xf32>
    %208 = arith.addf %206, %207 : vector<16x1xf32>
    %209 = math.rsqrt %208 : vector<16x1xf32>
    %210 = vector.broadcast %209 : vector<16x1xf32> to vector<16x32xf32>
    %211 = arith.mulf %201, %210 : vector<16x32xf32>
    %212 = tpu.concatenate %194, %211 in 1 : vector<16x32xf32>, vector<16x32xf32> -> vector<16x64xf32>
    %213 = vector.broadcast %10 : vector<1x64xf32> to vector<16x64xf32>
    %214 = arith.mulf %212, %213 : vector<16x64xf32>
    %215 = vector.broadcast %11 : vector<1x64xf32> to vector<16x64xf32>
    %216 = arith.addf %214, %215 : vector<16x64xf32>
    %c0_52 = arith.constant 0 : index
    %c0_53 = arith.constant 0 : index
    %217 = vector.load %arg6[%c0_52, %c0_53] : memref<64x64xf32, #tpu.memory_space<vmem>>, vector<64x64xf32>
    %cst_54 = arith.constant dense<0.000000e+00> : vector<16x64xf32>
    %218 = tpu.matmul %216, %217, %cst_54 {dimension_numbers = #tpu.dot_dimension_numbers<[1], [0], [0], [1], [0, 0, 1, 1], [], []>} : vector<16x64xf32>, vector<64x64xf32>, vector<16x64xf32> -> vector<16x64xf32>
    %219 = vector.broadcast %12 : vector<1x64xf32> to vector<16x64xf32>
    %220 = arith.addf %218, %219 : vector<16x64xf32>
    %221 = arith.mulf %220, %220 : vector<16x64xf32>
    %222 = arith.mulf %220, %221 : vector<16x64xf32>
    %cst_55 = arith.constant 4.471500e-02 : f32
    %223 = vector.broadcast %cst_55 : f32 to vector<16x64xf32>
    %224 = arith.mulf %223, %222 : vector<16x64xf32>
    %225 = arith.addf %220, %224 : vector<16x64xf32>
    %cst_56 = arith.constant 0.797884583 : f32
    %226 = vector.broadcast %cst_56 : f32 to vector<16x64xf32>
    %227 = arith.mulf %226, %225 : vector<16x64xf32>
    %228 = math.tanh %227 : vector<16x64xf32>
    %cst_57 = arith.constant 1.000000e+00 : f32
    %229 = vector.broadcast %cst_57 : f32 to vector<16x64xf32>
    %230 = arith.addf %229, %228 : vector<16x64xf32>
    %cst_58 = arith.constant 5.000000e-01 : f32
    %231 = vector.broadcast %cst_58 : f32 to vector<16x64xf32>
    %232 = arith.mulf %231, %230 : vector<16x64xf32>
    %233 = arith.mulf %220, %232 : vector<16x64xf32>
    %c0_59 = arith.constant 0 : index
    %c0_60 = arith.constant 0 : index
    %234 = vector.load %arg7[%c0_59, %c0_60] : memref<64x64xf32, #tpu.memory_space<vmem>>, vector<64x64xf32>
    %cst_61 = arith.constant dense<0.000000e+00> : vector<16x64xf32>
    %235 = tpu.matmul %233, %234, %cst_61 {dimension_numbers = #tpu.dot_dimension_numbers<[1], [0], [0], [1], [0, 0, 1, 1], [], []>} : vector<16x64xf32>, vector<64x64xf32>, vector<16x64xf32> -> vector<16x64xf32>
    %236 = vector.broadcast %13 : vector<1x64xf32> to vector<16x64xf32>
    %237 = arith.addf %235, %236 : vector<16x64xf32>
    %238 = arith.addf %237, %177 : vector<16x64xf32>
    %cst_62 = arith.constant dense<0.000000e+00> : vector<16xf32>
    %239 = vector.multi_reduction <add>, %238, %cst_62 [1] : vector<16x64xf32> to vector<16xf32>
    %240 = vector.shape_cast %239 : vector<16xf32> to vector<16x1xf32>
    %cst_63 = arith.constant 6.400000e+01 : f32
    %241 = vector.broadcast %cst_63 : f32 to vector<16x1xf32>
    %242 = arith.divf %240, %241 : vector<16x1xf32>
    %243 = vector.broadcast %242 : vector<16x1xf32> to vector<16x64xf32>
    %244 = arith.subf %238, %243 : vector<16x64xf32>
    %245 = arith.mulf %244, %244 : vector<16x64xf32>
    %cst_64 = arith.constant dense<0.000000e+00> : vector<16xf32>
    %246 = vector.multi_reduction <add>, %245, %cst_64 [1] : vector<16x64xf32> to vector<16xf32>
    %247 = vector.shape_cast %246 : vector<16xf32> to vector<16x1xf32>
    %cst_65 = arith.constant 6.400000e+01 : f32
    %248 = vector.broadcast %cst_65 : f32 to vector<16x1xf32>
    %249 = arith.divf %247, %248 : vector<16x1xf32>
    %cst_66 = arith.constant 9.99999974E-6 : f32
    %250 = vector.broadcast %cst_66 : f32 to vector<16x1xf32>
    %251 = arith.addf %249, %250 : vector<16x1xf32>
    %252 = math.rsqrt %251 : vector<16x1xf32>
    %253 = vector.broadcast %252 : vector<16x1xf32> to vector<16x64xf32>
    %254 = arith.mulf %244, %253 : vector<16x64xf32>
    %255 = vector.broadcast %14 : vector<1x64xf32> to vector<16x64xf32>
    %256 = arith.mulf %254, %255 : vector<16x64xf32>
    %257 = vector.broadcast %15 : vector<1x64xf32> to vector<16x64xf32>
    %258 = arith.addf %256, %257 : vector<16x64xf32>
    %c0_67 = arith.constant 0 : index
    %c0_68 = arith.constant 0 : index
    %259 = vector.load %arg8[%c0_67, %c0_68] : memref<64x32xf32, #tpu.memory_space<vmem>>, vector<64x32xf32>
    %cst_69 = arith.constant dense<0.000000e+00> : vector<16x32xf32>
    %260 = tpu.matmul %258, %259, %cst_69 {dimension_numbers = #tpu.dot_dimension_numbers<[1], [0], [0], [1], [0, 0, 1, 1], [], []>} : vector<16x64xf32>, vector<64x32xf32>, vector<16x32xf32> -> vector<16x32xf32>
    %261 = vector.broadcast %7 : vector<1x32xf32> to vector<16x32xf32>
    %262 = arith.addf %260, %261 : vector<16x32xf32>
    %c0_70 = arith.constant 0 : index
    %c0_71 = arith.constant 0 : index
    %263 = vector.load %arg16[%c0_70, %c0_71] : memref<16x32xf32, #tpu.memory_space<vmem>>, vector<16x32xf32>
    tpu.vector_store %arg16[%c0_70, %c0_71], %262 {strides = array<i32>} : memref<16x32xf32, #tpu.memory_space<vmem>>, vector<16x32xf32>,
    return
  }
}

</mosaic_0001>

<bundles_post_ra>
// kernel: tpu_custom_call.1
= control target key start
LH: loop header
LB: loop body
LE: loop exit
PB: predicated region body
PF: predicated region fallthrough
CT: control target
= control target key end

     0   :  { %s4594_s0 = inlined_call_operand.vmem [shape: f32[16,32], index: 0, kind: input, shape index: {}]   ;;  %s4595_s1 = inlined_call_operand.vmem [shape: f32[16,32], index: 1, kind: input, shape index: {}]   ;;  %s4596_s2 = inlined_call_operand.vmem [shape: f32[32,96], index: 2, kind: input, shape index: {}]   ;;  %s4597_s3 = inlined_call_operand.vmem [shape: f32[32,96], index: 3, kind: input, shape index: {}]   ;;  %s4598_s4 = inlined_call_operand.vmem [shape: f32[1,96], index: 4, kind: input, shape index: {}]   ;;  %s4599_s5 = inlined_call_operand.vmem [shape: f32[64,64], index: 5, kind: input, shape index: {}]   ;;  %s4600_s6 = inlined_call_operand.vmem [shape: f32[64,64], index: 6, kind: input, shape index: {}]   ;;  %s4601_s7 = inlined_call_operand.vmem [shape: f32[64,64], index: 7, kind: input, shape index: {}]   ;;  %s4602_s8 = inlined_call_operand.vmem [shape: f32[64,32], index: 8, kind: input, shape index: {}]   ;;  %s4603_s9 = inlined_call_operand.hbm [shape: f32[5,32], index: 9, kind: input, shape index: {}]   ;;  %s4604_s10 = inlined_call_operand.hbm [shape: f32[7,64], index: 10, kind: input, shape index: {}]   ;;  %s4605_s11 = inlined_call_operand.vmem [shape: f32[128,16], index: 11, kind: input, shape index: {}]   ;;  %s4606_s12 = inlined_call_operand.vmem [shape: f32[16,128], index: 12, kind: input, shape index: {}]   ;;  %s4607_s13 = inlined_call_operand.vmem [shape: f32[64,16], index: 13, kind: input, shape index: {}]   ;;  %s4608_s14 = inlined_call_operand.vmem [shape: f32[32,16], index: 14, kind: input, shape index: {}]   ;;  %s4609_s15 = inlined_call_operand.vmem [shape: f32[16,16], index: 15, kind: input, shape index: {}]   ;;  %s4610_s16 = inlined_call_operand.hbm [shape: f32[16,32], index: 16, kind: output, shape index: {}]  }
   0x1   :  { %4612 = sst [smem:[#allocation11_spill]] %s4594_s0 }
   0x2   :  { %21 = vsyncpa [#allocation3], 0 }
   0x3   :  { %22 = vsyncpa [#allocation6], 0 }
   0x4   :  { %23 = vsyncpa [#allocation4], 0  ;;  %s3324_s21 = smov [#allocation2]   ;;  %s3325_s23 = smov [#allocation5]  }
   0x5   :  { %s48_s22 = sshll.u32 %s3324_s21, 4  ;;  %s58_s24 = sshll.u32 %s3325_s23, 4  ;;  %s49_s22 = int_to_ptr.vmem [resolvable:$true] %s48_s22  ;;  %s59_s24 = int_to_ptr.vmem [resolvable:$true] %s58_s24 }
   0x6   :  { %s3252_s27 = scalar_lea.hbm %s4603_s9, 128 }
   0x7   :  { %p3253_p0 = scmp.ne.s32.totalorder %s4603_s9, %s3252_s27  ;;  %p3256_p1 = scmp.lt.u32.totalorder %s3252_s27, %s4603_s9 }
   0x9   :  { %p3258_p2 = pnand %p3256_p1, %p3253_p0 }
   0xb   :  { %3261 = shalt.err (!%p3258_p2)
}
   0xc   :  { %s3262_s17 = scalar_lea.vmem %s49_s22, 128  ;;  %p3267_p4 = scmp.lt.s32.totalorder %s49_s22, %s49_s22 }
   0xd   :  { %p3263_p3 = scmp.ne.s32.totalorder %s49_s22, %s3262_s17  ;;  %p3268_p5 = scmp.lt.s32.totalorder %s3262_s17, %s3262_s17 }
   0xf   :  { %p3269_p6 = por %p3268_p5, %p3267_p4 }
  0x11   :  { %p3270_p7 = pnand %p3269_p6, %p3263_p3 }
  0x13   :  { %3273 = shalt.err (!%p3270_p7)
}
  0x14   :  { %51 = dma.hbm_to_vmem [thread:$0]  %s4603_s9, 128, %s49_s22, [#allocation3]  }
  0x15   :  { %s3274_s23 = scalar_lea.hbm %s4604_s10, 128 }
  0x16   :  { %p3275_p8 = scmp.ne.s32.totalorder %s4604_s10, %s3274_s23  ;;  %p3278_p9 = scmp.lt.u32.totalorder %s3274_s23, %s4604_s10 }
  0x18   :  { %p3280_p10 = pnand %p3278_p9, %p3275_p8 }
  0x1a   :  { %3283 = shalt.err (!%p3280_p10)
}
  0x1b   :  { %s3284_s29 = scalar_lea.vmem %s59_s24, 128  ;;  %p3289_p12 = scmp.lt.s32.totalorder %s59_s24, %s59_s24 }
  0x1c   :  { %p3285_p11 = scmp.ne.s32.totalorder %s59_s24, %s3284_s29  ;;  %p3290_p13 = scmp.lt.s32.totalorder %s3284_s29, %s3284_s29 }
  0x1e   :  { %p3291_p0 = por %p3290_p13, %p3289_p12 }
  0x20   :  { %p3292_p1 = pnand %p3291_p0, %p3285_p11 }
  0x22   :  { %3295 = shalt.err (!%p3292_p1)
}
  0x23   :  { %61 = dma.hbm_to_vmem [thread:$0]  %s4604_s10, 128, %s59_s24, [#allocation6]  }
  0x24   :  { %3318 = dma.done.wait [#allocation3], 128  }
  0x25   :  { %3319 = vsyncadd [#allocation3], 4294967168 }
  0x26   :  { %3320 = dma.done.wait [#allocation6], 128  }
  0x27   :  { %3321 = vsyncadd [#allocation6], 4294967168  ;;  %vm102_vm0 = vcmask 261120   ;;  %v80_v0 = vld [vmem:[%s4595_s1] sm:$0xff]  ;;  %v81_v1 = vld [vmem:[%s4595_s1 + $0x8] sm:$0xff]  ;;  %s4613_s21 = sld [smem:[#allocation11_spill]]  ;;  %v130_v33 = vlaneseq }
  0x28   :  { %v142_v3 = vsel %vm102_vm0, %v80_v0, 0.0  ;;  %v145_v6 = vsel %vm102_vm0, %v81_v1, 0.0  ;;  %v82_v37 = vld [vmem:[#allocation2] sm:$0x1f]  ;;  %vm192_vm1 = vcmask 130048   ;;  %s3326_s26 = smov 32  }
  0x29   :  { %143 = vadd.xlane.f32.xlu0 %v142_v3  ;;  %v3466_v35 = vshrl.u32 %v130_v33, 7  ;;  %v180_v46 = vld [vmem:[%s4609_s15] sm:$0xff]  ;;  %vm441_vm2 = vcmask 523264   ;;  %vm444_vm3 = vcmask 785408   ;;  %s3329_s27 = smov 124   ;;  %s3330_s9 = smov 120  }
  0x2a   :  { %2774 = vmatprep.mubr.msk.f32.mxu1 %vm192_vm1, %v180_v46  ;;  %v94_v46 = vld [vmem:[%s4605_s11 + $0x50] sm:$0xff]  ;;  %s3331_s0 = smov 116   ;;  %s3333_s25 = smov 8   ;;  %vm830_vm4 = vcmask 31744   ;;  %vm839_vm5 = vcmask 64512   ;;  %vm848_vm6 = vcmask 97280  }
  0x2b   :  { %v170_v36 = vsub.s32 2, %v3466_v35  ;;  %v176_v41 = vsub.s32 3, %v3466_v35  ;;  %v132_v58 = vsub.s32 0, %v3466_v35  ;;  %v138_v63 = vsub.s32 1, %v3466_v35  ;;  %s3334_s28 = smov 12  }
  0x2d   :  { %v78_v2 = vld [vmem:[%s4613_s21] sm:$0xff]  ;;  %v79_v5 = vld [vmem:[%s4613_s21 + $0x8] sm:$0xff]  ;;  %146 = vadd.xlane.f32.xlu0 %v145_v6  ;;  %v171_v40 = vrot.slane %v82_v37, %v170_v36  ;;  %v177_v45 = vrot.slane %v82_v37, %v176_v41  ;;  %v133_v62 = vrot.slane %v82_v37, %v132_v58 }
  0x2e   :  { %v103_v4 = vsel %vm102_vm0, %v78_v2, 0.0  ;;  %v106_v7 = vsel %vm102_vm0, %v79_v5, 0.0 }
  0x2f   :  { %104 = vadd.xlane.f32.xlu1 %v103_v4 }
  0x33   :  { %107 = vadd.xlane.f32.xlu1 %v106_v7 }
  0xb6   :  { %v144_v8 = vpop.xlane.xlu0 %143 }
  0xb7   :  { %v148_v10 = vmul.f32 0.03125, %v144_v8  ;;  %v280_v8 = vld [vmem:[%s4596_s2] sm:$0xff] }
  0xb9   :  { %v150_v12 = vsub.f32 %v80_v0, %v148_v10 }
  0xba   :  { %v147_v14 = vpop.xlane.xlu0 %146 }
  0xbb   :  { %v149_v16 = vmul.f32 0.03125, %v147_v14  ;;  %v152_v17 = vmul.f32 %v150_v12, %v150_v12  ;;  %v282_v14 = vld [vmem:[%s4596_s2 + $0x10] sm:$0xff] }
  0xbc   :  { %v105_v9 = vpop.xlane.xlu1 %104 }
  0xbd   :  { %v110_v11 = vmul.f32 0.03125, %v105_v9  ;;  %v151_v20 = vsub.f32 %v81_v1, %v149_v16  ;;  %v154_v21 = vsel %vm102_vm0, %v152_v17, 0.0  ;;  %v281_v9 = vld [vmem:[%s4596_s2 + $0x8] sm:$0xff] }
  0xbe   :  { %155 = vadd.xlane.f32.xlu0 %v154_v21  ;;  %v181_v16 = vld [vmem:[%s4609_s15 + $0x8] sm:$0xff]  ;;  %s3328_s15 = smov 64  }
  0xbf   :  { %v112_v13 = vsub.f32 %v78_v2, %v110_v11  ;;  %v153_v23 = vmul.f32 %v151_v20, %v151_v20  ;;  %v139_v2 = vrot.slane %v82_v37, %v138_v63  ;;  %v89_v37 = vld [vmem:[%s4605_s11 + $0x28] sm:$0xff] }
  0xc0   :  { %v108_v15 = vpop.xlane.xlu1 %107 }
  0xc1   :  { %v111_v18 = vmul.f32 0.03125, %v108_v15  ;;  %v114_v19 = vmul.f32 %v112_v13, %v112_v13  ;;  %v157_v26 = vsel %vm102_vm0, %v153_v23, 0.0  ;;  %v283_v15 = vld [vmem:[%s4596_s2 + $0x18] sm:$0xff]  ;;  %s3327_s2 = smov 96  }
  0xc2   :  { %158 = vadd.xlane.f32.xlu1 %v157_v26  ;;  %v3009_v17 = vpack.c.bf16 %v283_v15, %v282_v14 }
  0xc3   :  { %v113_v22 = vsub.f32 %v79_v5, %v111_v18  ;;  %v116_v24 = vsel %vm102_vm0, %v114_v19, 0.0 }
  0xc4   :  { %117 = vadd.xlane.f32.xlu0 %v116_v24 }
  0xc5   :  { %v115_v25 = vmul.f32 %v113_v22, %v113_v22 }
  0xc7   :  { %v119_v27 = vsel %vm102_vm0, %v115_v25, 0.0 }
  0xc8   :  { %120 = vadd.xlane.f32.xlu1 %v119_v27 }
 0x14b   :  { %v156_v28 = vpop.xlane.xlu0 %155 }
 0x14c   :  { %v160_v29 = vmul.f32 0.03125, %v156_v28  ;;  %v84_v28 = vld [vmem:[%s4605_s11] sm:$0xff] }
 0x14e   :  { %v162_v30 = vadd.f32 1e-05, %v160_v29  ;;  %v85_v29 = vld [vmem:[%s4605_s11 + $0x8] sm:$0xff] }
 0x14f   :  { %v159_v31 = vpop.xlane.xlu1 %158 }
 0x150   :  { %3175 = vrsqrt.f32 %v162_v30  ;;  %v161_v32 = vmul.f32 0.03125, %v159_v31  ;;  %v86_v30 = vld [vmem:[%s4605_s11 + $0x10] sm:$0xff]  ;;  %v3566_v31 = vpack.c.bf16 %v85_v29, %v84_v28 }
 0x151   :  { %v118_v51 = vpop.xlane.xlu0 %117 }
 0x152   :  { %v163_v34 = vadd.f32 1e-05, %v161_v32  ;;  %v122_v53 = vmul.f32 0.03125, %v118_v51  ;;  %v87_v32 = vld [vmem:[%s4605_s11 + $0x18] sm:$0xff]  ;;  %3014 = vmatprep.subr.bf16.mxu0 %v3566_v31 }
 0x153   :  { %v3571_v33 = vpack.c.bf16 %v87_v32, %v86_v30  ;;  %3016 = vmatpush3.bf16.msra.mxu0 %v3566_v31 }
 0x154   :  { %3177 = vrsqrt.f32 %v163_v34  ;;  %v124_v55 = vadd.f32 1e-05, %v122_v53  ;;  %v88_v34 = vld [vmem:[%s4605_s11 + $0x20] sm:$0xff]  ;;  %v99_v53 = vld [vmem:[%s4605_s11 + $0x78] sm:$0xff] }
 0x155   :  { %v121_v52 = vpop.xlane.xlu1 %120  ;;  %3018 = vmatprep.subr.bf16.mxu0 %v3571_v33 }
 0x156   :  { %v123_v54 = vmul.f32 0.03125, %v121_v52  ;;  %3179 = vrsqrt.f32 %v124_v55  ;;  %v98_v52 = vld [vmem:[%s4605_s11 + $0x70] sm:$0xff] }
 0x157   :  { %3020 = vmatpush3.bf16.msra.mxu0 %v3571_v33 }
 0x158   :  { %v125_v56 = vadd.f32 1e-05, %v123_v54  ;;  %v3633_v54 = vpack.c.bf16 %v99_v53, %v98_v52 }
 0x15a   :  { %v3176_v38 = vpop.eup %3175  ;;  %3181 = vrsqrt.f32 %v125_v56 }
 0x15b   :  { %v166_v39 = vmul.f32 %v3176_v38, %v150_v12  ;;  %v3582_v38 = vpack.c.bf16 %v89_v37, %v88_v34 }
 0x15d   :  { %v172_v44 = vmul.f32 %v171_v40, %v166_v39  ;;  %v90_v39 = vld [vmem:[%s4605_s11 + $0x30] sm:$0xff]  ;;  %3022 = vmatprep.subr.bf16.mxu0 %v3582_v38 }
 0x15e   :  { %v3178_v42 = vpop.eup %3177  ;;  %3024 = vmatpush3.bf16.msra.mxu0 %v3582_v38 }
 0x15f   :  { %v167_v43 = vmul.f32 %v3178_v42, %v151_v20  ;;  %v178_v48 = vadd.f32 %v177_v45, %v172_v44  ;;  %v93_v44 = vld [vmem:[%s4605_s11 + $0x48] sm:$0xff] }
 0x160   :  { %v3180_v57 = vpop.eup %3179 }
 0x161   :  { %v173_v47 = vmul.f32 %v171_v40, %v167_v43  ;;  %v128_v60 = vmul.f32 %v3180_v57, %v112_v13  ;;  %v3005_v13 = vpack.c.bf16 %v281_v9, %v280_v8  ;;  %v91_v40 = vld [vmem:[%s4605_s11 + $0x38] sm:$0xff]  ;;  %v92_v43 = vld [vmem:[%s4605_s11 + $0x40] sm:$0xff] }
 0x162   :  { %v3592_v42 = vpack.c.bf16 %v91_v40, %v90_v39 }
 0x163   :  { %v179_v49 = vadd.f32 %v177_v45, %v173_v47  ;;  %v134_v0 = vmul.f32 %v133_v62, %v128_v60  ;;  %v3602_v45 = vpack.c.bf16 %v93_v44, %v92_v43  ;;  %v95_v47 = vld [vmem:[%s4605_s11 + $0x58] sm:$0xff] }
 0x164   :  { %v3182_v59 = vpop.eup %3181  ;;  %3026 = vmatprep.subr.bf16.mxu0 %v3592_v42 }
 0x165   :  { %v3170_v50 = vpack.i.bf16 %v179_v49, %v178_v48  ;;  %v129_v61 = vmul.f32 %v3182_v59, %v113_v22  ;;  %v140_v6 = vadd.f32 %v139_v2, %v134_v0  ;;  %3028 = vmatpush3.bf16.msra.mxu0 %v3592_v42 }
 0x166   :  { %3030 = vmatprep.subr.bf16.mxu0 %v3602_v45 }
 0x167   :  { %3171 = vrot.lane.b32.xlu0 %v3170_v50, %s3326_s26  ;;  %v135_v1 = vmul.f32 %v133_v62, %v129_v61  ;;  %v97_v50 = vld [vmem:[%s4605_s11 + $0x68] sm:$0xff] }
 0x169   :  { %v141_v7 = vadd.f32 %v139_v2, %v135_v1  ;;  %3032 = vmatpush3.bf16.msra.mxu0 %v3602_v45 }
 0x1d9   :  { %v3172_v3 = vpop.permute.xlu0 %3171 }
 0x1da   :  { %v3174_v4 = vunpack.i.h.bf16 %v3172_v3  ;;  %v3173_v5 = vunpack.i.l.bf16 %v3172_v3 }
 0x1dc   :  { %v190_v10 = vsel %vm102_vm0, %v140_v6, %v3173_v5  ;;  %v191_v11 = vsel %vm102_vm0, %v141_v7, %v3174_v4 }
 0x1dd   :  { %v3001_v12 = vpack.c.bf16 %v191_v11, %v190_v10 }
 0x1df   :  { %3002 = vmatprep.subr.bf16.mxu1 %v3001_v12 }
 0x1e0   :  { %3004 = vmatpush3.bf16.msra.mxu1 %v3001_v12 }
 0x1e1   :  { %3006 = vmatprep.subr.bf16.mxu1 %v3005_v13 }
 0x1e3   :  { %2775 = vmatmul.mubr.msk.f32.vlgmr.msra.gmra.mrb[0].mxu1 %vm192_vm1, %v181_v16 }
 0x1e4   :  { %3008 = vmatpush3.bf16.msra.mxu1 %v3005_v13  ;;  %2785 = vmatprep.mubr.msk.f32.mxu1 %vm102_vm0, %v140_v6 }
 0x1e5   :  { %3010 = vmatprep.subr.bf16.mxu1 %v3009_v17 }
 0x1e8   :  { %3012 = vmatpush3.bf16.msra.mxu1 %v3009_v17 }
 0x1eb   :  { %2786 = vmatmul.mubr.msk.f32.vlgmr.msra.gmra.mrb[2].mxu1 %vm102_vm0, %v141_v7 }
 0x1ec   :  { %2788 = vmatprep.mubr.msk.f32.mxu1 %vm102_vm0, %v178_v48  ;;  %v3612_v48 = vpack.c.bf16 %v95_v47, %v94_v46 }
 0x1ee   :  { %3034 = vmatprep.subr.bf16.mxu0 %v3612_v48 }
 0x1ef   :  { %2789 = vmatmul.mubr.msk.f32.gmra.mrb[4].mxu1 %vm102_vm0, %v179_v49  ;;  %3036 = vmatpush3.bf16.msra.mxu0 %v3612_v48  ;;  %v96_v49 = vld [vmem:[%s4605_s11 + $0x60] sm:$0xff] }
 0x1f0   :  { %v3623_v51 = vpack.c.bf16 %v97_v50, %v96_v49 }
 0x1f2   :  { %3038 = vmatprep.subr.bf16.mxu0 %v3623_v51 }
 0x1f3   :  { %3040 = vmatpush3.bf16.msra.mxu0 %v3623_v51 }
 0x1f4   :  { %3042 = vmatprep.subr.bf16.mxu0 %v3633_v54 }
 0x1f7   :  { %3044 = vmatpush3.bf16.msra.mxu0 %v3633_v54 }
 0x1f8   :  { %3058 = vmatprep.subr.bf16.mxu0 %v3566_v31 }
 0x2b6   :  { %v2776_v18 = vpop.f32.mrb[0].mxu1 }
 0x2b7   :  { %v265_v19 = vpop.f32.mrb[1].mxu1 }
 0x2b8   :  { %276 = vrot.lane.b32.xlu1 %v265_v19, %s3327_s2  ;;  %2791 = vmatprep.mubr.msk.f32.mxu1 %vm102_vm0, %v265_v19 }
 0x2b9   :  { %2792 = vmatmul.mubr.msk.f32.gmra.mrb[6].mxu1 %vm102_vm0, %v2776_v18 }
 0x2bc   :  { %278 = vrot.lane.b32.xlu1 %v2776_v18, %s3327_s2 }
 0x2be   :  { %v3511_v20 = vpop.f32.mrb[2].mxu1 }
 0x2bf   :  { %475 = vrot.lane.b32.xlu0 %v3511_v20, %s3326_s26  ;;  %v3515_v21 = vpop.f32.mrb[3].mxu1 }
 0x2c0   :  { %419 = vrot.lane.b32.xlu1 %v3511_v20, %s3327_s2 }
 0x2c2   :  { %v3519_v22 = vpop.f32.mrb[4].mxu1 }
 0x2c3   :  { %473 = vrot.lane.b32.xlu0 %v3515_v21, %s3326_s26  ;;  %v3523_v23 = vpop.f32.mrb[5].mxu1 }
 0x2c4   :  { %449 = vrot.lane.b32.xlu1 %v3511_v20, %s3328_s15 }
 0x2c7   :  { %479 = vrot.lane.b32.xlu0 %v3519_v22, %s3326_s26 }
 0x2c8   :  { %417 = vrot.lane.b32.xlu1 %v3515_v21, %s3327_s2 }
 0x2cb   :  { %457 = vrot.lane.b32.xlu0 %v3519_v22, %s3327_s2 }
 0x2cc   :  { %447 = vrot.lane.b32.xlu1 %v3515_v21, %s3328_s15 }
 0x2cf   :  { %455 = vrot.lane.b32.xlu0 %v3523_v23, %s3327_s2 }
 0x2d0   :  { %487 = vrot.lane.b32.xlu1 %v3519_v22, %s3328_s15 }
 0x2d4   :  { %477 = vrot.lane.b32.xlu1 %v3523_v23, %s3326_s26 }
 0x2d8   :  { %485 = vrot.lane.b32.xlu1 %v3523_v23, %s3328_s15 }
 0x32a   :  { %v277_v24 = vpop.permute.xlu1 %276 }
 0x32b   :  { %2794 = vmatprep.mubr.msk.f32.mxu1 %vm102_vm0, %v277_v24 }
 0x32e   :  { %v279_v25 = vpop.permute.xlu1 %278 }
 0x32f   :  { %2795 = vmatmul.mubr.msk.f32.gmra.mrb[8].mxu1 %vm102_vm0, %v279_v25 }
 0x331   :  { %v476_v62 = vpop.permute.xlu0 %475 }
 0x332   :  { %v420_v57 = vpop.permute.xlu1 %419  ;;  %v510_v10 = vsel %vm102_vm0, %v3511_v20, %v476_v62 }
 0x333   :  { %v440_v13 = vsel %vm102_vm0, %v420_v57, %v3519_v22 }
 0x335   :  { %v474_v1 = vpop.permute.xlu0 %473 }
 0x336   :  { %v3653_v59 = vpop.permute.xlu1 %449  ;;  %v509_v16 = vsel %vm102_vm0, %v3515_v21, %v474_v1 }
 0x337   :  { %v518_v12 = vsel %vm441_vm2, %v510_v10, %v3653_v59 }
 0x338   :  { %v526_v19 = vsel %vm444_vm3, %v518_v12, %v420_v57  ;;  %v410_v12 = vld [vmem:[%s4607_s13 + $0x18] sm:$0xff] }
 0x339   :  { %v480_v3 = vpop.permute.xlu0 %479 }
 0x33a   :  { %v418_v60 = vpop.permute.xlu1 %417  ;;  %v512_v46 = vsel %vm102_vm0, %v3519_v22, %v480_v3 }
 0x33b   :  { %v439_v25 = vsel %vm102_vm0, %v418_v60, %v3523_v23 }
 0x33d   :  { %v3657_v6 = vpop.permute.xlu0 %457 }
 0x33e   :  { %v3655_v61 = vpop.permute.xlu1 %447 }
 0x33f   :  { %v517_v20 = vsel %vm441_vm2, %v509_v16, %v3655_v61  ;;  %v409_v16 = vld [vmem:[%s4607_s13 + $0x10] sm:$0xff] }
 0x340   :  { %v525_v44 = vsel %vm444_vm3, %v517_v20, %v418_v60 }
 0x341   :  { %v3659_v8 = vpop.permute.xlu0 %455 }
 0x342   :  { %v488_v0 = vpop.permute.xlu1 %487 }
 0x343   :  { %v520_v52 = vsel %vm441_vm2, %v512_v46, %v488_v0 }
 0x344   :  { %v528_v60 = vsel %vm444_vm3, %v520_v52, %v3657_v6 }
 0x346   :  { %v478_v2 = vpop.permute.xlu1 %477 }
 0x347   :  { %v511_v28 = vsel %vm102_vm0, %v3523_v23, %v478_v2 }
 0x34a   :  { %v486_v4 = vpop.permute.xlu1 %485 }
 0x34b   :  { %v519_v21 = vsel %vm441_vm2, %v511_v28, %v486_v4  ;;  %v411_v28 = vld [vmem:[%s4607_s13 + $0x20] sm:$0xff] }
 0x34c   :  { %v527_v53 = vsel %vm444_vm3, %v519_v21, %v3659_v8  ;;  %v414_v21 = vld [vmem:[%s4607_s13 + $0x38] sm:$0xff] }
 0x38c   :  { %v3545_v26 = vpop.f32.mrb[6].mxu1 }
 0x38d   :  { %427 = vrot.lane.b32.xlu1 %v3545_v26, %s3326_s26  ;;  %v3549_v27 = vpop.f32.mrb[7].mxu1 }
 0x38e   :  { %425 = vrot.lane.b32.xlu0 %v3549_v27, %s3326_s26 }
 0x391   :  { %489 = vrot.lane.b32.xlu1 %v3549_v27, %s3328_s15 }
 0x395   :  { %497 = vrot.lane.b32.xlu1 %v3549_v27, %s3327_s2 }
 0x3ff   :  { %v428_v5 = vpop.permute.xlu1 %427 }
 0x400   :  { %v426_v9 = vpop.permute.xlu0 %425  ;;  %v443_v14 = vsel %vm441_vm2, %v440_v13, %v428_v5  ;;  %v514_v22 = vsel %vm102_vm0, %v3545_v26, %v428_v5 }
 0x401   :  { %v513_v29 = vsel %vm102_vm0, %v3549_v27, %v426_v9  ;;  %v442_v30 = vsel %vm441_vm2, %v439_v25, %v426_v9 }
 0x402   :  { %v3638_v55 = vpop.f32.mrb[8].mxu1 }
 0x403   :  { %435 = vrot.lane.b32.xlu0 %v3638_v55, %s3328_s15  ;;  %v398_v56 = vpop.f32.mrb[9].mxu1  ;;  %v490_v7 = vpop.permute.xlu1 %489 }
 0x404   :  { %461 = vrot.lane.b32.xlu1 %v398_v56, %s3326_s26  ;;  %v521_v32 = vsel %vm441_vm2, %v513_v29, %v490_v7 }
 0x407   :  { %433 = vrot.lane.b32.xlu0 %v398_v56, %s3328_s15  ;;  %v498_v11 = vpop.permute.xlu1 %497 }
 0x408   :  { %501 = vrot.lane.b32.xlu1 %v398_v56, %s3327_s2  ;;  %v529_v39 = vsel %vm444_vm3, %v521_v32, %v498_v11  ;;  %v413_v32 = vld [vmem:[%s4607_s13 + $0x30] sm:$0xff] }
 0x40b   :  { %491 = vrot.lane.b32.xlu0 %v3545_v26, %s3328_s15 }
 0x40f   :  { %499 = vrot.lane.b32.xlu0 %v3545_v26, %s3327_s2 }
 0x413   :  { %463 = vrot.lane.b32.xlu0 %v3638_v55, %s3326_s26 }
 0x417   :  { %503 = vrot.lane.b32.xlu0 %v3638_v55, %s3327_s2 }
 0x475   :  { %v436_v15 = vpop.permute.xlu0 %435 }
 0x476   :  { %v446_v17 = vsel %vm444_vm3, %v443_v14, %v436_v15  ;;  %v3671_v18 = vpop.permute.xlu1 %461 }
 0x477   :  { %v534_v24 = vmul.f32 %v526_v19, %v446_v17  ;;  %v515_v34 = vsel %vm102_vm0, %v398_v56, %v3671_v18  ;;  %v536_v1 = vmul.f32 %v528_v60, %v446_v17 }
 0x479   :  { %v434_v37 = vpop.permute.xlu0 %433 }
 0x47a   :  { %v445_v40 = vsel %vm444_vm3, %v442_v30, %v434_v37  ;;  %v523_v43 = vsel %vm441_vm2, %v515_v34, %v434_v37  ;;  %v502_v23 = vpop.permute.xlu1 %501 }
 0x47b   :  { %v531_v47 = vsel %vm444_vm3, %v523_v43, %v502_v23  ;;  %v533_v49 = vmul.f32 %v525_v44, %v445_v40  ;;  %v537_v50 = vmul.f32 %v529_v39, %v445_v40  ;;  %v535_v62 = vmul.f32 %v527_v53, %v445_v40 }
 0x47c   :  { %v539_v56 = vmul.f32 %v531_v47, %v445_v40 }
 0x47d   :  { %2829 = vmatprep.mubr.f32.mxu0 %v533_v49  ;;  %v492_v57 = vpop.permute.xlu0 %491 }
 0x47e   :  { %2830 = vmatmul.mubr.f32.vlgmr.msra.gmra.mrb[0].mxu0 %v534_v24  ;;  %v522_v0 = vsel %vm441_vm2, %v514_v22, %v492_v57  ;;  %v412_v24 = vld [vmem:[%s4607_s13 + $0x28] sm:$0xff] }
 0x47f   :  { %2832 = vmatprep.mubr.f32.mxu0 %v535_v62  ;;  %3060 = vmatpush3.bf16.msra.mxu0 %v3566_v31 }
 0x480   :  { %3062 = vmatprep.subr.bf16.mxu0 %v3571_v33 }
 0x481   :  { %v500_v2 = vpop.permute.xlu0 %499 }
 0x482   :  { %v530_v3 = vsel %vm444_vm3, %v522_v0, %v500_v2  ;;  %2833 = vmatmul.mubr.f32.gmra.mrb[2].mxu0 %v536_v1 }
 0x483   :  { %v538_v4 = vmul.f32 %v530_v3, %v446_v17  ;;  %2835 = vmatprep.mubr.f32.mxu0 %v537_v50  ;;  %3064 = vmatpush3.bf16.msra.mxu0 %v3571_v33 }
 0x484   :  { %3066 = vmatprep.subr.bf16.mxu0 %v3582_v38 }
 0x485   :  { %v3707_v7 = vpop.permute.xlu0 %463 }
 0x486   :  { %v516_v31 = vsel %vm102_vm0, %v3638_v55, %v3707_v7  ;;  %2836 = vmatmul.mubr.f32.gmra.mrb[4].mxu0 %v538_v4 }
 0x487   :  { %2838 = vmatprep.mubr.f32.mxu0 %v539_v56  ;;  %3068 = vmatpush3.bf16.msra.mxu0 %v3582_v38  ;;  %v524_v5 = vsel %vm441_vm2, %v516_v31, %v436_v15  ;;  %v408_v38 = vld [vmem:[%s4607_s13 + $0x8] sm:$0xff] }
 0x488   :  { %3070 = vmatprep.subr.bf16.mxu0 %v3592_v42 }
 0x489   :  { %v504_v9 = vpop.permute.xlu0 %503 }
 0x48a   :  { %v532_v10 = vsel %vm444_vm3, %v524_v5, %v504_v9 }
 0x48b   :  { %v540_v33 = vmul.f32 %v532_v10, %v446_v17  ;;  %3072 = vmatpush3.bf16.msra.mxu0 %v3592_v42  ;;  %v407_v42 = vld [vmem:[%s4607_s13] sm:$0xff]  ;;  %s3332_s13 = smov 4  }
 0x48c   :  { %3074 = vmatprep.subr.bf16.mxu0 %v3602_v45 }
 0x48d   :  { %2839 = vmatmul.mubr.f32.gmra.mrb[6].mxu0 %v540_v33 }
 0x48f   :  { %3076 = vmatpush3.bf16.msra.mxu0 %v3602_v45 }
 0x490   :  { %3078 = vmatprep.subr.bf16.mxu0 %v3612_v48 }
 0x493   :  { %3080 = vmatpush3.bf16.msra.mxu0 %v3612_v48 }
 0x494   :  { %3082 = vmatprep.subr.bf16.mxu0 %v3623_v51 }
 0x497   :  { %3084 = vmatpush3.bf16.msra.mxu0 %v3623_v51 }
 0x498   :  { %3086 = vmatprep.subr.bf16.mxu0 %v3633_v54 }
 0x49b   :  { %3088 = vmatpush3.bf16.msra.mxu0 %v3633_v54 }
 0x551   :  { %v2831_v45 = vpop.f32.mrb[0].mxu0 }
 0x552   :  { %v3731_v55 = vadd.f32 %v2831_v45, %v408_v38  ;;  %v607_v48 = vpop.f32.mrb[1].mxu0 }
 0x553   :  { %v3733_v11 = vadd.f32 %v607_v48, %v407_v42 }
 0x554   :  { %656 = vrot.lane.b32.xlu0 %v3731_v55, %s3329_s27 }
 0x555   :  { %v2834_v51 = vpop.f32.mrb[2].mxu0  ;;  %654 = vrot.lane.b32.xlu1 %v3733_v11, %s3329_s27 }
 0x556   :  { %v617_v54 = vpop.f32.mrb[3].mxu0  ;;  %v3746_v15 = vadd.f32 %v2834_v51, %v410_v12 }
 0x557   :  { %v3755_v17 = vadd.f32 %v617_v54, %v409_v16 }
 0x558   :  { %688 = vrot.lane.b32.xlu0 %v3731_v55, %s3330_s9 }
 0x559   :  { %686 = vrot.lane.b32.xlu1 %v3733_v11, %s3330_s9  ;;  %v2837_v13 = vpop.f32.mrb[4].mxu0 }
 0x55a   :  { %v627_v14 = vpop.f32.mrb[5].mxu0  ;;  %v3768_v25 = vadd.f32 %v2837_v13, %v412_v24 }
 0x55b   :  { %v3777_v29 = vadd.f32 %v627_v14, %v411_v28 }
 0x55c   :  { %720 = vrot.lane.b32.xlu0 %v3731_v55, %s3331_s0 }
 0x55d   :  { %660 = vrot.lane.b32.xlu1 %v3746_v15, %s3329_s27 }
 0x560   :  { %718 = vrot.lane.b32.xlu0 %v3733_v11, %s3331_s0  ;;  %v2840_v19 = vpop.f32.mrb[6].mxu0 }
 0x561   :  { %658 = vrot.lane.b32.xlu1 %v3755_v17, %s3329_s27  ;;  %v637_v20 = vpop.f32.mrb[7].mxu0  ;;  %v3790_v30 = vadd.f32 %v2840_v19, %v414_v21 }
 0x562   :  { %v3799_v34 = vadd.f32 %v637_v20, %v413_v32 }
 0x564   :  { %692 = vrot.lane.b32.xlu0 %v3746_v15, %s3330_s9 }
 0x565   :  { %690 = vrot.lane.b32.xlu1 %v3755_v17, %s3330_s9 }
 0x568   :  { %724 = vrot.lane.b32.xlu0 %v3746_v15, %s3331_s0 }
 0x569   :  { %664 = vrot.lane.b32.xlu1 %v3768_v25, %s3329_s27 }
 0x56c   :  { %722 = vrot.lane.b32.xlu0 %v3755_v17, %s3331_s0 }
 0x56d   :  { %662 = vrot.lane.b32.xlu1 %v3777_v29, %s3329_s27 }
 0x570   :  { %696 = vrot.lane.b32.xlu0 %v3768_v25, %s3330_s9 }
 0x571   :  { %694 = vrot.lane.b32.xlu1 %v3777_v29, %s3330_s9 }
 0x574   :  { %728 = vrot.lane.b32.xlu0 %v3768_v25, %s3331_s0 }
 0x575   :  { %668 = vrot.lane.b32.xlu1 %v3790_v30, %s3329_s27 }
 0x578   :  { %726 = vrot.lane.b32.xlu0 %v3777_v29, %s3331_s0 }
 0x579   :  { %666 = vrot.lane.b32.xlu1 %v3799_v34, %s3329_s27 }
 0x57c   :  { %700 = vrot.lane.b32.xlu0 %v3790_v30, %s3330_s9 }
 0x57d   :  { %698 = vrot.lane.b32.xlu1 %v3799_v34, %s3330_s9 }
 0x580   :  { %732 = vrot.lane.b32.xlu0 %v3790_v30, %s3331_s0 }
 0x581   :  { %730 = vrot.lane.b32.xlu1 %v3799_v34, %s3331_s0 }
 0x5c6   :  { %v657_v37 = vpop.permute.xlu0 %656 }
 0x5c7   :  { %v655_v39 = vpop.permute.xlu1 %654  ;;  %v679_v43 = vmax.f32 %v3731_v55, %v657_v37 }
 0x5c8   :  { %v678_v47 = vmax.f32 %v3733_v11, %v655_v39 }
 0x5ca   :  { %v689_v40 = vpop.permute.xlu0 %688 }
 0x5cb   :  { %v687_v23 = vpop.permute.xlu1 %686  ;;  %v711_v44 = vmax.f32 %v679_v43, %v689_v40 }
 0x5cc   :  { %v710_v52 = vmax.f32 %v678_v47, %v687_v23 }
 0x5ce   :  { %v721_v46 = vpop.permute.xlu0 %720 }
 0x5cf   :  { %v3815_v49 = vmax.f32 %v711_v44, %v721_v46  ;;  %v661_v50 = vpop.permute.xlu1 %660 }
 0x5d0   :  { %v681_v60 = vmax.f32 %v3746_v15, %v661_v50 }
 0x5d1   :  { %760 = vrot.lane.b32.xlu0 %v3815_v49, %s3332_s13 }
 0x5d2   :  { %v719_v53 = vpop.permute.xlu0 %718 }
 0x5d3   :  { %v3819_v56 = vmax.f32 %v710_v52, %v719_v53  ;;  %v659_v57 = vpop.permute.xlu1 %658 }
 0x5d4   :  { %v680_v2 = vmax.f32 %v3755_v17, %v659_v57 }
 0x5d5   :  { %784 = vrot.lane.b32.xlu0 %v3815_v49, %s3333_s25  ;;  %758 = vrot.lane.b32.xlu1 %v3819_v56, %s3332_s13 }
 0x5d6   :  { %v693_v62 = vpop.permute.xlu0 %692 }
 0x5d7   :  { %v691_v22 = vpop.permute.xlu1 %690  ;;  %v713_v1 = vmax.f32 %v681_v60, %v693_v62 }
 0x5d8   :  { %v712_v31 = vmax.f32 %v680_v2, %v691_v22 }
 0x5d9   :  { %808 = vrot.lane.b32.xlu0 %v3815_v49, %s3334_s28  ;;  %782 = vrot.lane.b32.xlu1 %v3819_v56, %s3333_s25 }
 0x5da   :  { %v725_v0 = vpop.permute.xlu0 %724 }
 0x5db   :  { %v3831_v3 = vmax.f32 %v713_v1, %v725_v0  ;;  %v665_v4 = vpop.permute.xlu1 %664 }
 0x5dc   :  { %v683_v38 = vmax.f32 %v3768_v25, %v665_v4 }
 0x5dd   :  { %806 = vrot.lane.b32.xlu1 %v3819_v56, %s3334_s28  ;;  %764 = vrot.lane.b32.xlu0 %v3831_v3, %s3332_s13 }
 0x5de   :  { %v723_v5 = vpop.permute.xlu0 %722 }
 0x5df   :  { %v3837_v9 = vmax.f32 %v712_v31, %v723_v5  ;;  %v663_v10 = vpop.permute.xlu1 %662 }
 0x5e0   :  { %v682_v51 = vmax.f32 %v3777_v29, %v663_v10 }
 0x5e1   :  { %788 = vrot.lane.b32.xlu0 %v3831_v3, %s3333_s25  ;;  %762 = vrot.lane.b32.xlu1 %v3837_v9, %s3332_s13 }
 0x5e2   :  { %v697_v33 = vpop.permute.xlu0 %696 }
 0x5e3   :  { %v695_v42 = vpop.permute.xlu1 %694  ;;  %v715_v45 = vmax.f32 %v683_v38, %v697_v33 }
 0x5e4   :  { %v714_v13 = vmax.f32 %v682_v51, %v695_v42 }
 0x5e5   :  { %812 = vrot.lane.b32.xlu0 %v3831_v3, %s3334_s28  ;;  %786 = vrot.lane.b32.xlu1 %v3837_v9, %s3333_s25 }
 0x5e6   :  { %v729_v48 = vpop.permute.xlu0 %728 }
 0x5e7   :  { %v3849_v54 = vmax.f32 %v715_v45, %v729_v48  ;;  %v669_v12 = vpop.permute.xlu1 %668 }
 0x5e8   :  { %v685_v24 = vmax.f32 %v3790_v30, %v669_v12 }
 0x5e9   :  { %810 = vrot.lane.b32.xlu1 %v3837_v9, %s3334_s28  ;;  %768 = vrot.lane.b32.xlu0 %v3849_v54, %s3332_s13 }
 0x5ea   :  { %v727_v14 = vpop.permute.xlu0 %726 }
 0x5eb   :  { %v3855_v16 = vmax.f32 %v714_v13, %v727_v14  ;;  %v667_v19 = vpop.permute.xlu1 %666 }
 0x5ec   :  { %v684_v37 = vmax.f32 %v3799_v34, %v667_v19 }
 0x5ed   :  { %792 = vrot.lane.b32.xlu0 %v3849_v54, %s3333_s25  ;;  %766 = vrot.lane.b32.xlu1 %v3855_v16, %s3332_s13 }
 0x5ee   :  { %v701_v20 = vpop.permute.xlu0 %700 }
 0x5ef   :  { %v699_v28 = vpop.permute.xlu1 %698  ;;  %v717_v21 = vmax.f32 %v685_v24, %v701_v20 }
 0x5f0   :  { %v716_v43 = vmax.f32 %v684_v37, %v699_v28 }
 0x5f1   :  { %816 = vrot.lane.b32.xlu0 %v3849_v54, %s3334_s28  ;;  %790 = vrot.lane.b32.xlu1 %v3855_v16, %s3333_s25 }
 0x5f2   :  { %v733_v32 = vpop.permute.xlu0 %732 }
 0x5f3   :  { %v3867_v39 = vmax.f32 %v717_v21, %v733_v32  ;;  %v731_v40 = vpop.permute.xlu1 %730 }
 0x5f4   :  { %v3873_v23 = vmax.f32 %v716_v43, %v731_v40 }
 0x5f5   :  { %814 = vrot.lane.b32.xlu1 %v3855_v16, %s3334_s28  ;;  %772 = vrot.lane.b32.xlu0 %v3867_v39, %s3332_s13 }
 0x5f9   :  { %770 = vrot.lane.b32.xlu1 %v3873_v23, %s3332_s13  ;;  %796 = vrot.lane.b32.xlu0 %v3867_v39, %s3333_s25 }
 0x5fd   :  { %794 = vrot.lane.b32.xlu1 %v3873_v23, %s3333_s25  ;;  %820 = vrot.lane.b32.xlu0 %v3867_v39, %s3334_s28 }
 0x601   :  { %818 = vrot.lane.b32.xlu1 %v3873_v23, %s3334_s28 }
 0x643   :  { %v761_v44 = vpop.permute.xlu0 %760 }
 0x644   :  { %v832_v50 = vsel %vm830_vm4, %v3815_v49, %v761_v44 }
 0x647   :  { %v759_v46 = vpop.permute.xlu1 %758  ;;  %v785_v47 = vpop.permute.xlu0 %784 }
 0x648   :  { %v841_v52 = vsel %vm839_vm5, %v832_v50, %v785_v47  ;;  %v831_v22 = vsel %vm830_vm4, %v3819_v56, %v759_v46 }
 0x64b   :  { %v783_v53 = vpop.permute.xlu1 %782  ;;  %v809_v57 = vpop.permute.xlu0 %808 }
 0x64c   :  { %v850_v62 = vsel %vm848_vm6, %v841_v52, %v809_v57  ;;  %v840_v1 = vsel %vm839_vm5, %v831_v22, %v783_v53 }
 0x64d   :  { %v858_v60 = vsub.f32 %v3731_v55, %v850_v62 }
 0x64f   :  { %v867_v0 = vmul.f32 1.442695, %v858_v60  ;;  %v807_v2 = vpop.permute.xlu1 %806  ;;  %v765_v4 = vpop.permute.xlu0 %764 }
 0x650   :  { %v849_v31 = vsel %vm848_vm6, %v840_v1, %v807_v2  ;;  %v834_v55 = vsel %vm830_vm4, %v3831_v3, %v765_v4 }
 0x651   :  { %3183 = vpow2.f32 %v867_v0  ;;  %v857_v49 = vsub.f32 %v3733_v11, %v849_v31 }
 0x653   :  { %v865_v5 = vmul.f32 1.442695, %v857_v49  ;;  %v763_v10 = vpop.permute.xlu1 %762  ;;  %v789_v33 = vpop.permute.xlu0 %788 }
 0x654   :  { %v843_v38 = vsel %vm839_vm5, %v834_v55, %v789_v33  ;;  %v833_v51 = vsel %vm830_vm4, %v3837_v9, %v763_v10 }
 0x655   :  { %3185 = vpow2.f32 %v865_v5 }
 0x657   :  { %v787_v56 = vpop.permute.xlu1 %786  ;;  %v813_v42 = vpop.permute.xlu0 %812 }
 0x658   :  { %v852_v45 = vsel %vm848_vm6, %v843_v38, %v813_v42  ;;  %v842_v11 = vsel %vm839_vm5, %v833_v51, %v787_v56 }
 0x659   :  { %v860_v48 = vsub.f32 %v3746_v15, %v852_v45 }
 0x65b   :  { %v3902_v12 = vpop.eup %3183  ;;  %v871_v13 = vmul.f32 1.442695, %v860_v48  ;;  %v811_v14 = vpop.permute.xlu1 %810 }
 0x65c   :  { %v769_v19 = vpop.permute.xlu0 %768  ;;  %v851_v3 = vsel %vm848_vm6, %v842_v11, %v811_v14  ;;  %891 = vrot.lane.b32.xlu0 %v3902_v12, %s3329_s27 }
 0x65d   :  { %3187 = vpow2.f32 %v871_v13  ;;  %v859_v20 = vsub.f32 %v3755_v17, %v851_v3  ;;  %v836_v21 = vsel %vm830_vm4, %v3849_v54, %v769_v19  ;;  %v100_v3 = vld [vmem:[%s4606_s12] sm:$0xff] }
 0x65f   :  { %v3909_v24 = vpop.eup %3185  ;;  %v869_v15 = vmul.f32 1.442695, %v859_v20  ;;  %v767_v28 = vpop.permute.xlu1 %766  ;;  %v101_v20 = vld [vmem:[%s4606_s12 + $0x8] sm:$0xff] }
 0x660   :  { %v793_v9 = vpop.permute.xlu0 %792  ;;  %889 = vrot.lane.b32.xlu1 %v3909_v24, %s3329_s27  ;;  %923 = vrot.lane.b32.xlu0 %v3902_v12, %s3330_s9  ;;  %v835_v44 = vsel %vm830_vm4, %v3855_v16, %v767_v28 }
 0x661   :  { %3189 = vpow2.f32 %v869_v15  ;;  %v845_v32 = vsel %vm839_vm5, %v836_v21, %v793_v9  ;;  %v3997_v15 = vpack.c.bf16 %v101_v20, %v100_v3 }
 0x663   :  { %v791_v37 = vpop.permute.xlu1 %790  ;;  %3046 = vmatprep.subr.bf16.mxu1 %v3997_v15 }
 0x664   :  { %v817_v40 = vpop.permute.xlu0 %816  ;;  %921 = vrot.lane.b32.xlu1 %v3909_v24, %s3330_s9  ;;  %955 = vrot.lane.b32.xlu0 %v3902_v12, %s3331_s0  ;;  %v844_v54 = vsel %vm839_vm5, %v835_v44, %v791_v37 }
 0x665   :  { %v854_v17 = vsel %vm848_vm6, %v845_v32, %v817_v40  ;;  %3048 = vmatpush3.bf16.msra.mxu1 %v3997_v15 }
 0x666   :  { %v862_v43 = vsub.f32 %v3768_v25, %v854_v17 }
 0x667   :  { %v3926_v46 = vpop.eup %3187  ;;  %v815_v50 = vpop.permute.xlu1 %814 }
 0x668   :  { %v875_v47 = vmul.f32 1.442695, %v862_v43  ;;  %v773_v52 = vpop.permute.xlu0 %772  ;;  %v853_v53 = vsel %vm848_vm6, %v844_v54, %v815_v50  ;;  %953 = vrot.lane.b32.xlu0 %v3909_v24, %s3331_s0  ;;  %895 = vrot.lane.b32.xlu1 %v3926_v46, %s3329_s27 }
 0x669   :  { %v861_v25 = vsub.f32 %v3777_v29, %v853_v53  ;;  %v838_v22 = vsel %vm830_vm4, %v3867_v39, %v773_v52 }
 0x66a   :  { %3191 = vpow2.f32 %v875_v47 }
 0x66b   :  { %v3935_v57 = vpop.eup %3189  ;;  %v873_v16 = vmul.f32 1.442695, %v861_v25  ;;  %v771_v62 = vpop.permute.xlu1 %770 }
 0x66c   :  { %v797_v60 = vpop.permute.xlu0 %796  ;;  %927 = vrot.lane.b32.xlu0 %v3926_v46, %s3330_s9  ;;  %893 = vrot.lane.b32.xlu1 %v3935_v57, %s3329_s27  ;;  %v837_v31 = vsel %vm830_vm4, %v3873_v23, %v771_v62 }
 0x66d   :  { %3193 = vpow2.f32 %v873_v16  ;;  %v847_v1 = vsel %vm839_vm5, %v838_v22, %v797_v60 }
 0x66f   :  { %v795_v0 = vpop.permute.xlu1 %794 }
 0x670   :  { %v821_v2 = vpop.permute.xlu0 %820  ;;  %959 = vrot.lane.b32.xlu0 %v3926_v46, %s3331_s0  ;;  %925 = vrot.lane.b32.xlu1 %v3935_v57, %s3330_s9  ;;  %v846_v39 = vsel %vm839_vm5, %v837_v31, %v795_v0 }
 0x671   :  { %v856_v29 = vsel %vm848_vm6, %v847_v1, %v821_v2 }
 0x672   :  { %v864_v4 = vsub.f32 %v3790_v30, %v856_v29 }
 0x673   :  { %v819_v10 = vpop.permute.xlu1 %818 }
 0x674   :  { %v3952_v49 = vpop.eup %3191  ;;  %v879_v5 = vmul.f32 1.442695, %v864_v4  ;;  %v855_v33 = vsel %vm848_vm6, %v846_v39, %v819_v10  ;;  %957 = vrot.lane.b32.xlu0 %v3935_v57, %s3331_s0 }
 0x675   :  { %899 = vrot.lane.b32.xlu1 %v3952_v49, %s3329_s27  ;;  %v863_v30 = vsub.f32 %v3799_v34, %v855_v33 }
 0x676   :  { %3195 = vpow2.f32 %v879_v5 }
 0x677   :  { %v3961_v55 = vpop.eup %3193  ;;  %v877_v23 = vmul.f32 1.442695, %v863_v30 }
 0x678   :  { %931 = vrot.lane.b32.xlu0 %v3952_v49, %s3330_s9 }
 0x679   :  { %897 = vrot.lane.b32.xlu1 %v3961_v55, %s3329_s27  ;;  %3197 = vpow2.f32 %v877_v23 }
 0x67c   :  { %963 = vrot.lane.b32.xlu0 %v3952_v49, %s3331_s0 }
 0x67d   :  { %929 = vrot.lane.b32.xlu1 %v3961_v55, %s3330_s9 }
 0x680   :  { %v3971_v38 = vpop.eup %3195  ;;  %961 = vrot.lane.b32.xlu0 %v3961_v55, %s3331_s0 }
 0x681   :  { %903 = vrot.lane.b32.xlu1 %v3971_v38, %s3329_s27 }
 0x683   :  { %v3977_v34 = vpop.eup %3197 }
 0x684   :  { %935 = vrot.lane.b32.xlu0 %v3971_v38, %s3330_s9 }
 0x685   :  { %901 = vrot.lane.b32.xlu1 %v3977_v34, %s3329_s27 }
 0x688   :  { %967 = vrot.lane.b32.xlu0 %v3971_v38, %s3331_s0 }
 0x689   :  { %933 = vrot.lane.b32.xlu1 %v3977_v34, %s3330_s9 }
 0x68d   :  { %965 = vrot.lane.b32.xlu1 %v3977_v34, %s3331_s0 }
 0x6ce   :  { %v892_v56 = vpop.permute.xlu0 %891 }
 0x6cf   :  { %v914_v48 = vadd.f32 %v3902_v12, %v892_v56 }
 0x6d2   :  { %v890_v42 = vpop.permute.xlu1 %889  ;;  %v924_v45 = vpop.permute.xlu0 %923 }
 0x6d3   :  { %v946_v51 = vadd.f32 %v924_v45, %v914_v48  ;;  %v913_v14 = vadd.f32 %v3909_v24, %v890_v42 }
 0x6d6   :  { %v922_v11 = vpop.permute.xlu1 %921  ;;  %v956_v13 = vpop.permute.xlu0 %955 }
 0x6d7   :  { %v978_v19 = vadd.f32 %v956_v13, %v946_v51  ;;  %v945_v28 = vadd.f32 %v922_v11, %v913_v14 }
 0x6d9   :  { %3199 = vrcp.f32 %v978_v19 }
 0x6da   :  { %v896_v9 = vpop.permute.xlu1 %895  ;;  %v954_v21 = vpop.permute.xlu0 %953 }
 0x6db   :  { %v977_v32 = vadd.f32 %v954_v21, %v945_v28  ;;  %v916_v17 = vadd.f32 %v3926_v46, %v896_v9 }
 0x6dd   :  { %3201 = vrcp.f32 %v977_v32 }
 0x6de   :  { %v894_v37 = vpop.permute.xlu1 %893  ;;  %v928_v40 = vpop.permute.xlu0 %927 }
 0x6df   :  { %v948_v43 = vadd.f32 %v928_v40, %v916_v17  ;;  %v915_v50 = vadd.f32 %v3935_v57, %v894_v37 }
 0x6e2   :  { %v926_v44 = vpop.permute.xlu1 %925  ;;  %v960_v54 = vpop.permute.xlu0 %959 }
 0x6e3   :  { %v4002_v47 = vpop.eup %3199  ;;  %v980_v52 = vadd.f32 %v960_v54, %v948_v43  ;;  %v947_v53 = vadd.f32 %v926_v44, %v915_v50 }
 0x6e4   :  { %1003 = vrot.lane.b32.xlu0 %v4002_v47, %s3332_s13 }
 0x6e5   :  { %3203 = vrcp.f32 %v980_v52 }
 0x6e6   :  { %v958_v16 = vpop.permute.xlu0 %957 }
 0x6e7   :  { %v900_v25 = vpop.permute.xlu1 %899  ;;  %v4007_v62 = vpop.eup %3201  ;;  %v979_v60 = vadd.f32 %v958_v16, %v947_v53 }
 0x6e8   :  { %1027 = vrot.lane.b32.xlu0 %v4002_v47, %s3333_s25  ;;  %1001 = vrot.lane.b32.xlu1 %v4007_v62, %s3332_s13  ;;  %v918_v0 = vadd.f32 %v3952_v49, %v900_v25 }
 0x6e9   :  { %3205 = vrcp.f32 %v979_v60 }
 0x6ea   :  { %v932_v1 = vpop.permute.xlu0 %931 }
 0x6eb   :  { %v898_v22 = vpop.permute.xlu1 %897  ;;  %v950_v2 = vadd.f32 %v932_v1, %v918_v0 }
 0x6ec   :  { %1051 = vrot.lane.b32.xlu0 %v4002_v47, %s3334_s28  ;;  %1025 = vrot.lane.b32.xlu1 %v4007_v62, %s3333_s25  ;;  %v917_v39 = vadd.f32 %v3961_v55, %v898_v22 }
 0x6ee   :  { %v964_v4 = vpop.permute.xlu0 %963 }
 0x6ef   :  { %v930_v29 = vpop.permute.xlu1 %929  ;;  %v4018_v31 = vpop.eup %3203  ;;  %v982_v5 = vadd.f32 %v964_v4, %v950_v2 }
 0x6f0   :  { %1049 = vrot.lane.b32.xlu1 %v4007_v62, %s3334_s28  ;;  %1007 = vrot.lane.b32.xlu0 %v4018_v31, %s3332_s13  ;;  %v949_v10 = vadd.f32 %v930_v29, %v917_v39 }
 0x6f1   :  { %3207 = vrcp.f32 %v982_v5 }
 0x6f2   :  { %v962_v30 = vpop.permute.xlu0 %961 }
 0x6f3   :  { %v904_v33 = vpop.permute.xlu1 %903  ;;  %v3206_v23 = vpop.eup %3205  ;;  %v981_v56 = vadd.f32 %v962_v30, %v949_v10 }
 0x6f4   :  { %1031 = vrot.lane.b32.xlu0 %v4018_v31, %s3333_s25  ;;  %1005 = vrot.lane.b32.xlu1 %v3206_v23, %s3332_s13  ;;  %v920_v48 = vadd.f32 %v3971_v38, %v904_v33 }
 0x6f5   :  { %3209 = vrcp.f32 %v981_v56 }
 0x6f6   :  { %v936_v45 = vpop.permute.xlu0 %935 }
 0x6f7   :  { %v902_v42 = vpop.permute.xlu1 %901  ;;  %v952_v51 = vadd.f32 %v936_v45, %v920_v48 }
 0x6f8   :  { %1055 = vrot.lane.b32.xlu0 %v4018_v31, %s3334_s28  ;;  %1029 = vrot.lane.b32.xlu1 %v3206_v23, %s3333_s25  ;;  %v919_v19 = vadd.f32 %v3977_v34, %v902_v42 }
 0x6fa   :  { %v968_v13 = vpop.permute.xlu0 %967 }
 0x6fb   :  { %v934_v11 = vpop.permute.xlu1 %933  ;;  %v3208_v14 = vpop.eup %3207  ;;  %v984_v3 = vadd.f32 %v968_v13, %v952_v51 }
 0x6fc   :  { %1053 = vrot.lane.b32.xlu1 %v3206_v23, %s3334_s28  ;;  %1011 = vrot.lane.b32.xlu0 %v3208_v14, %s3332_s13  ;;  %v951_v20 = vadd.f32 %v934_v11, %v919_v19 }
 0x6fd   :  { %3211 = vrcp.f32 %v984_v3 }
 0x6ff   :  { %v966_v28 = vpop.permute.xlu1 %965  ;;  %v3210_v9 = vpop.eup %3209 }
 0x700   :  { %v983_v21 = vadd.f32 %v966_v28, %v951_v20  ;;  %1035 = vrot.lane.b32.xlu0 %v3208_v14, %s3333_s25  ;;  %1009 = vrot.lane.b32.xlu1 %v3210_v9, %s3332_s13 }
 0x702   :  { %3213 = vrcp.f32 %v983_v21 }
 0x704   :  { %1059 = vrot.lane.b32.xlu0 %v3208_v14, %s3334_s28  ;;  %1033 = vrot.lane.b32.xlu1 %v3210_v9, %s3333_s25 }
 0x707   :  { %v4039_v32 = vpop.eup %3211 }
 0x708   :  { %1057 = vrot.lane.b32.xlu1 %v3210_v9, %s3334_s28  ;;  %1015 = vrot.lane.b32.xlu0 %v4039_v32, %s3332_s13 }
 0x70c   :  { %v3214_v37 = vpop.eup %3213  ;;  %1039 = vrot.lane.b32.xlu0 %v4039_v32, %s3333_s25 }
 0x70d   :  { %1013 = vrot.lane.b32.xlu1 %v3214_v37, %s3332_s13 }
 0x710   :  { %1063 = vrot.lane.b32.xlu0 %v4039_v32, %s3334_s28 }
 0x711   :  { %1037 = vrot.lane.b32.xlu1 %v3214_v37, %s3333_s25 }
 0x715   :  { %1061 = vrot.lane.b32.xlu1 %v3214_v37, %s3334_s28 }
 0x756   :  { %v1004_v40 = vpop.permute.xlu0 %1003 }
 0x757   :  { %v1074_v50 = vsel %vm830_vm4, %v4002_v47, %v1004_v40 }
 0x75a   :  { %v1002_v17 = vpop.permute.xlu1 %1001  ;;  %v1028_v43 = vpop.permute.xlu0 %1027 }
 0x75b   :  { %v1073_v52 = vsel %vm830_vm4, %v4007_v62, %v1002_v17  ;;  %v1082_v53 = vsel %vm839_vm5, %v1074_v50, %v1028_v43 }
 0x75e   :  { %v1026_v44 = vpop.permute.xlu1 %1025  ;;  %v1052_v54 = vpop.permute.xlu0 %1051 }
 0x75f   :  { %v1081_v25 = vsel %vm839_vm5, %v1073_v52, %v1026_v44  ;;  %v1090_v16 = vsel %vm848_vm6, %v1082_v53, %v1052_v54 }
 0x760   :  { %v1098_v2 = vmul.f32 %v3902_v12, %v1090_v16 }
 0x762   :  { %v1050_v60 = vpop.permute.xlu1 %1049  ;;  %v1008_v22 = vpop.permute.xlu0 %1007 }
 0x763   :  { %v1089_v1 = vsel %vm848_vm6, %v1081_v25, %v1050_v60  ;;  %v1076_v39 = vsel %vm830_vm4, %v4018_v31, %v1008_v22  ;;  %v1349_v22 = vld [vmem:[%s4597_s3 + $0x18] sm:$0xff] }
 0x764   :  { %v1097_v0 = vmul.f32 %v3909_v24, %v1089_v1  ;;  %v467_v1 = vsel %vm102_vm0, %v3655_v61, %v3659_v8 }
 0x766   :  { %2845 = vmatprep.mubr.msk.f32.mxu1 %vm192_vm1, %v1097_v0  ;;  %v1006_v47 = vpop.permute.xlu1 %1005  ;;  %v1032_v29 = vpop.permute.xlu0 %1031 }
 0x767   :  { %2846 = vmatmul.mubr.msk.f32.vlgmr.msra.gmra.mrb[10].mxu1 %vm192_vm1, %v1098_v2  ;;  %v1075_v5 = vsel %vm830_vm4, %v3206_v23, %v1006_v47  ;;  %v1084_v10 = vsel %vm839_vm5, %v1076_v39, %v1032_v29 }
 0x76a   :  { %v1030_v62 = vpop.permute.xlu1 %1029  ;;  %v1056_v4 = vpop.permute.xlu0 %1055 }
 0x76b   :  { %v1083_v33 = vsel %vm839_vm5, %v1075_v5, %v1030_v62  ;;  %v1092_v24 = vsel %vm848_vm6, %v1084_v10, %v1056_v4 }
 0x76c   :  { %v1100_v45 = vmul.f32 %v3926_v46, %v1092_v24 }
 0x76e   :  { %v1054_v12 = vpop.permute.xlu1 %1053  ;;  %v1012_v30 = vpop.permute.xlu0 %1011 }
 0x76f   :  { %v1091_v56 = vsel %vm848_vm6, %v1083_v33, %v1054_v12  ;;  %v1078_v11 = vsel %vm830_vm4, %v3208_v14, %v1012_v30 }
 0x770   :  { %v1099_v42 = vmul.f32 %v3935_v57, %v1091_v56 }
 0x772   :  { %v1010_v48 = vpop.permute.xlu1 %1009  ;;  %2848 = vmatprep.mubr.msk.f32.mxu1 %vm192_vm1, %v1099_v42  ;;  %v1036_v31 = vpop.permute.xlu0 %1035 }
 0x773   :  { %2849 = vmatmul.mubr.msk.f32.gmra.mrb[12].mxu1 %vm192_vm1, %v1100_v45  ;;  %v1077_v13 = vsel %vm830_vm4, %v3210_v9, %v1010_v48  ;;  %v1086_v19 = vsel %vm839_vm5, %v1078_v11, %v1036_v31 }
 0x776   :  { %v1034_v23 = vpop.permute.xlu1 %1033  ;;  %v1060_v51 = vpop.permute.xlu0 %1059 }
 0x777   :  { %v1085_v3 = vsel %vm839_vm5, %v1077_v13, %v1034_v23  ;;  %v1094_v57 = vsel %vm848_vm6, %v1086_v19, %v1060_v51 }
 0x778   :  { %v1102_v40 = vmul.f32 %v3952_v49, %v1094_v57 }
 0x77a   :  { %v1058_v20 = vpop.permute.xlu1 %1057  ;;  %v1016_v46 = vpop.permute.xlu0 %1015 }
 0x77b   :  { %v1093_v28 = vsel %vm848_vm6, %v1085_v3, %v1058_v20  ;;  %v1080_v44 = vsel %vm830_vm4, %v4039_v32, %v1016_v46  ;;  %v1346_v32 = vld [vmem:[%s4597_s3] sm:$0xff] }
 0x77c   :  { %v1101_v21 = vmul.f32 %v3961_v55, %v1093_v28 }
 0x77e   :  { %2851 = vmatprep.mubr.msk.f32.mxu1 %vm192_vm1, %v1101_v21  ;;  %v1040_v14 = vpop.permute.xlu0 %1039 }
 0x77f   :  { %v1014_v17 = vpop.permute.xlu1 %1013  ;;  %2852 = vmatmul.mubr.msk.f32.gmra.mrb[14].mxu1 %vm192_vm1, %v1102_v40  ;;  %v1088_v50 = vsel %vm839_vm5, %v1080_v44, %v1040_v14 }
 0x780   :  { %v1079_v54 = vsel %vm830_vm4, %v3214_v37, %v1014_v17  ;;  %v1347_v37 = vld [vmem:[%s4597_s3 + $0x8] sm:$0xff] }
 0x781   :  { %v3049_v60 = vpack.c.bf16 %v1347_v37, %v1346_v32 }
 0x782   :  { %v1064_v43 = vpop.permute.xlu0 %1063 }
 0x783   :  { %v1038_v9 = vpop.permute.xlu1 %1037  ;;  %v1096_v55 = vsel %vm848_vm6, %v1088_v50, %v1064_v43  ;;  %3050 = vmatprep.subr.bf16.mxu1 %v3049_v60 }
 0x784   :  { %v1087_v52 = vsel %vm839_vm5, %v1079_v54, %v1038_v9  ;;  %v1104_v16 = vmul.f32 %v3971_v38, %v1096_v55  ;;  %3052 = vmatpush3.bf16.msra.mxu1 %v3049_v60  ;;  %v1348_v38 = vld [vmem:[%s4597_s3 + $0x10] sm:$0xff] }
 0x785   :  { %v3053_v2 = vpack.c.bf16 %v1349_v22, %v1348_v38 }
 0x787   :  { %v1062_v49 = vpop.permute.xlu1 %1061  ;;  %3054 = vmatprep.subr.bf16.mxu1 %v3053_v2 }
 0x788   :  { %v1095_v53 = vsel %vm848_vm6, %v1087_v52, %v1062_v49  ;;  %3056 = vmatpush3.bf16.msra.mxu1 %v3053_v2 }
 0x789   :  { %v1103_v25 = vmul.f32 %v3977_v34, %v1095_v53  ;;  %v468_v34 = vsel %vm102_vm0, %v3653_v59, %v3657_v6  ;;  %v469_v59 = vsel %vm441_vm2, %v467_v1, %v3549_v27  ;;  %3090 = vmatprep.subr.bf16.mxu1 %v3997_v15 }
 0x78a   :  { %v470_v0 = vsel %vm441_vm2, %v468_v34, %v3545_v26  ;;  %v471_v29 = vsel %vm444_vm3, %v469_v59, %v3671_v18 }
 0x78b   :  { %2854 = vmatprep.mubr.msk.f32.mxu1 %vm192_vm1, %v1103_v25  ;;  %v472_v6 = vsel %vm444_vm3, %v470_v0, %v3707_v7 }
 0x78c   :  { %2855 = vmatmul.mubr.msk.f32.gmra.mrb[16].mxu1 %vm192_vm1, %v1104_v16 }
 0x83a   :  { %v2847_v47 = vpop.f32.mrb[10].mxu1 }
 0x83b   :  { %v1235_v62 = vmul.f32 %v2847_v47, %v472_v6  ;;  %v1195_v4 = vpop.f32.mrb[11].mxu1 }
 0x83c   :  { %v1234_v39 = vmul.f32 %v1195_v4, %v471_v29 }
 0x83d   :  { %1252 = vrot.lane.b32.xlu0 %v1235_v62, %s3327_s2 }
 0x83e   :  { %1250 = vrot.lane.b32.xlu1 %v1234_v39, %s3327_s2 }
 0x841   :  { %1284 = vrot.lane.b32.xlu0 %v1235_v62, %s3328_s15 }
 0x842   :  { %1282 = vrot.lane.b32.xlu1 %v1234_v39, %s3328_s15 }
 0x845   :  { %1316 = vrot.lane.b32.xlu0 %v1235_v62, %s3326_s26 }
 0x846   :  { %v2850_v26 = vpop.f32.mrb[12].mxu1 }
 0x847   :  { %v1237_v27 = vmul.f32 %v2850_v26, %v472_v6  ;;  %v1205_v61 = vpop.f32.mrb[13].mxu1 }
 0x848   :  { %v1236_v8 = vmul.f32 %v1205_v61, %v471_v29 }
 0x849   :  { %1314 = vrot.lane.b32.xlu0 %v1234_v39, %s3326_s26  ;;  %1256 = vrot.lane.b32.xlu1 %v1237_v27, %s3327_s2 }
 0x84d   :  { %1288 = vrot.lane.b32.xlu0 %v1237_v27, %s3328_s15  ;;  %1254 = vrot.lane.b32.xlu1 %v1236_v8, %s3327_s2 }
 0x851   :  { %1320 = vrot.lane.b32.xlu0 %v1237_v27, %s3326_s26  ;;  %1286 = vrot.lane.b32.xlu1 %v1236_v8, %s3328_s15 }
 0x852   :  { %v2853_v18 = vpop.f32.mrb[14].mxu1 }
 0x853   :  { %v1239_v7 = vmul.f32 %v2853_v18, %v472_v6  ;;  %v1215_v5 = vpop.f32.mrb[15].mxu1 }
 0x854   :  { %v1238_v10 = vmul.f32 %v1215_v5, %v471_v29 }
 0x855   :  { %1318 = vrot.lane.b32.xlu0 %v1236_v8, %s3326_s26  ;;  %1260 = vrot.lane.b32.xlu1 %v1239_v7, %s3327_s2 }
 0x859   :  { %1292 = vrot.lane.b32.xlu0 %v1239_v7, %s3328_s15  ;;  %1258 = vrot.lane.b32.xlu1 %v1238_v10, %s3327_s2 }
 0x85d   :  { %1324 = vrot.lane.b32.xlu0 %v1239_v7, %s3326_s26  ;;  %1290 = vrot.lane.b32.xlu1 %v1238_v10, %s3328_s15 }
 0x85f   :  { %v2856_v33 = vpop.f32.mrb[16].mxu1 }
 0x860   :  { %v1241_v24 = vmul.f32 %v2856_v33, %v472_v6  ;;  %v1225_v12 = vpop.f32.mrb[17].mxu1 }
 0x861   :  { %v1240_v30 = vmul.f32 %v1225_v12, %v471_v29  ;;  %1322 = vrot.lane.b32.xlu0 %v1238_v10, %s3326_s26 }
 0x862   :  { %1264 = vrot.lane.b32.xlu1 %v1241_v24, %s3327_s2 }
 0x865   :  { %1296 = vrot.lane.b32.xlu0 %v1241_v24, %s3328_s15 }
 0x866   :  { %1262 = vrot.lane.b32.xlu1 %v1240_v30, %s3327_s2 }
 0x869   :  { %1328 = vrot.lane.b32.xlu0 %v1241_v24, %s3326_s26 }
 0x86a   :  { %1294 = vrot.lane.b32.xlu1 %v1240_v30, %s3328_s15 }
 0x86e   :  { %1326 = vrot.lane.b32.xlu1 %v1240_v30, %s3326_s26 }
 0x8af   :  { %v1253_v56 = vpop.permute.xlu0 %1252 }
 0x8b0   :  { %v1251_v42 = vpop.permute.xlu1 %1250  ;;  %v1275_v51 = vadd.f32 %v1253_v56, %v1235_v62 }
 0x8b1   :  { %v1274_v23 = vadd.f32 %v1251_v42, %v1234_v39 }
 0x8b3   :  { %v1285_v45 = vpop.permute.xlu0 %1284 }
 0x8b4   :  { %v1283_v48 = vpop.permute.xlu1 %1282  ;;  %v1307_v13 = vadd.f32 %v1285_v45, %v1275_v51 }
 0x8b5   :  { %v1306_v11 = vadd.f32 %v1283_v48, %v1274_v23 }
 0x8b7   :  { %v1317_v31 = vpop.permute.xlu0 %1316 }
 0x8b8   :  { %v1339_v20 = vadd.f32 %v1317_v31, %v1307_v13 }
 0x8bb   :  { %v1257_v19 = vpop.permute.xlu1 %1256  ;;  %v1315_v3 = vpop.permute.xlu0 %1314 }
 0x8bc   :  { %v1338_v57 = vadd.f32 %v1315_v3, %v1306_v11  ;;  %v1277_v14 = vadd.f32 %v1257_v19, %v1237_v27  ;;  %v2621_v27 = vld [vmem:[%s4598_s4] ss:$0 sm:$0xff] }
 0x8be   :  { %2865 = vmatprep.mubr.msk.f32.mxu1 %vm102_vm0, %v1338_v57 }
 0x8bf   :  { %v1255_v46 = vpop.permute.xlu1 %1254  ;;  %2866 = vmatmul.mubr.msk.f32.vlgmr.msra.gmra.mrb[18].mxu1 %vm102_vm0, %v1339_v20  ;;  %v1289_v28 = vpop.permute.xlu0 %1288 }
 0x8c0   :  { %3092 = vmatpush3.bf16.msra.mxu1 %v3997_v15  ;;  %v1276_v17 = vadd.f32 %v1255_v46, %v1236_v8  ;;  %v1309_v43 = vadd.f32 %v1289_v28, %v1277_v14 }
 0x8c3   :  { %v1287_v21 = vpop.permute.xlu1 %1286  ;;  %v1321_v40 = vpop.permute.xlu0 %1320 }
 0x8c4   :  { %v1308_v9 = vadd.f32 %v1287_v21, %v1276_v17  ;;  %v1341_v52 = vadd.f32 %v1321_v40, %v1309_v43 }
 0x8c7   :  { %v1261_v44 = vpop.permute.xlu1 %1260  ;;  %v1319_v54 = vpop.permute.xlu0 %1318 }
 0x8c8   :  { %v1340_v50 = vadd.f32 %v1319_v54, %v1308_v9  ;;  %v1279_v15 = vadd.f32 %v1261_v44, %v1239_v7 }
 0x8ca   :  { %2868 = vmatprep.mubr.msk.f32.mxu1 %vm102_vm0, %v1340_v50 }
 0x8cb   :  { %v1259_v55 = vpop.permute.xlu1 %1258  ;;  %2869 = vmatmul.mubr.msk.f32.gmra.mrb[20].mxu1 %vm102_vm0, %v1341_v52  ;;  %v1293_v49 = vpop.permute.xlu0 %1292 }
 0x8cc   :  { %v1278_v16 = vadd.f32 %v1259_v55, %v1238_v10  ;;  %v1311_v37 = vadd.f32 %v1293_v49, %v1279_v15 }
 0x8cf   :  { %v1291_v53 = vpop.permute.xlu1 %1290  ;;  %v1325_v25 = vpop.permute.xlu0 %1324 }
 0x8d0   :  { %v1310_v32 = vadd.f32 %v1291_v53, %v1278_v16  ;;  %v1343_v22 = vadd.f32 %v1325_v25, %v1311_v37 }
 0x8d3   :  { %v1323_v34 = vpop.permute.xlu0 %1322 }
 0x8d4   :  { %v1265_v60 = vpop.permute.xlu1 %1264  ;;  %v1342_v38 = vadd.f32 %v1323_v34, %v1310_v32 }
 0x8d5   :  { %v1281_v6 = vadd.f32 %v1265_v60, %v1241_v24 }
 0x8d6   :  { %2871 = vmatprep.mubr.msk.f32.mxu1 %vm102_vm0, %v1342_v38 }
 0x8d7   :  { %2872 = vmatmul.mubr.msk.f32.gmra.mrb[22].mxu1 %vm102_vm0, %v1343_v22  ;;  %v1297_v0 = vpop.permute.xlu0 %1296 }
 0x8d8   :  { %v1263_v1 = vpop.permute.xlu1 %1262  ;;  %v1313_v62 = vadd.f32 %v1297_v0, %v1281_v6 }
 0x8d9   :  { %v1280_v59 = vadd.f32 %v1263_v1, %v1240_v30 }
 0x8db   :  { %v1329_v29 = vpop.permute.xlu0 %1328 }
 0x8dc   :  { %v1295_v2 = vpop.permute.xlu1 %1294  ;;  %v1345_v26 = vadd.f32 %v1329_v29, %v1313_v62 }
 0x8dd   :  { %v1312_v47 = vadd.f32 %v1295_v2, %v1280_v59 }
 0x8e0   :  { %v1327_v4 = vpop.permute.xlu1 %1326 }
 0x8e1   :  { %v1344_v39 = vadd.f32 %v1327_v4, %v1312_v47  ;;  %v1487_v4 = vld [vmem:[%s4608_s14 + $0x8] sm:$0xff] }
 0x8e3   :  { %2874 = vmatprep.mubr.msk.f32.mxu1 %vm102_vm0, %v1344_v39  ;;  %v1486_v39 = vld [vmem:[%s4608_s14] sm:$0xff] }
 0x8e4   :  { %2875 = vmatmul.mubr.msk.f32.gmra.mrb[24].mxu1 %vm102_vm0, %v1345_v26 }
 0x992   :  { %v2867_v61 = vpop.f32.mrb[18].mxu1 }
 0x993   :  { %v1453_v8 = vadd.f32 %v2867_v61, %v2621_v27  ;;  %v1447_v18 = vpop.f32.mrb[19].mxu1 }
 0x994   :  { %v1448_v7 = vadd.f32 %v2621_v27, %v1447_v18  ;;  %v1489_v18 = vld [vmem:[%s4608_s14 + $0x18] sm:$0xff] }
 0x995   :  { %1548 = vrot.lane.b32.xlu0 %v1453_v8, %s3326_s26  ;;  %1494 = vrot.lane.b32.xlu1 %v1453_v8, %s3327_s2 }
 0x999   :  { %1522 = vrot.lane.b32.xlu1 %v1453_v8, %s3328_s15  ;;  %1546 = vrot.lane.b32.xlu0 %v1448_v7, %s3326_s26 }
 0x99d   :  { %1492 = vrot.lane.b32.xlu1 %v1448_v7, %s3327_s2 }
 0x99e   :  { %v2870_v5 = vpop.f32.mrb[20].mxu1 }
 0x99f   :  { %v1463_v10 = vadd.f32 %v2870_v5, %v2621_v27  ;;  %v1457_v33 = vpop.f32.mrb[21].mxu1 }
 0x9a0   :  { %v1458_v24 = vadd.f32 %v2621_v27, %v1457_v33  ;;  %v1488_v33 = vld [vmem:[%s4608_s14 + $0x10] sm:$0xff] }
 0x9a1   :  { %1520 = vrot.lane.b32.xlu1 %v1448_v7, %s3328_s15  ;;  %1552 = vrot.lane.b32.xlu0 %v1463_v10, %s3326_s26 }
 0x9a5   :  { %1550 = vrot.lane.b32.xlu1 %v1458_v24, %s3326_s26 }
 0x9a9   :  { %1558 = vrot.lane.b32.xlu1 %v1458_v24, %s3328_s15 }
 0x9aa   :  { %v2873_v12 = vpop.f32.mrb[22].mxu1 }
 0x9ab   :  { %v4167_v30 = vadd.f32 %v2873_v12, %v2621_v27  ;;  %v1467_v56 = vpop.f32.mrb[23].mxu1 }
 0x9ac   :  { %v4169_v42 = vadd.f32 %v2621_v27, %v1467_v56 }
 0x9ad   :  { %1502 = vrot.lane.b32.xlu1 %v4167_v30, %s3326_s26 }
 0x9ae   :  { %1500 = vrot.lane.b32.xlu0 %v4169_v42, %s3326_s26 }
 0x9b1   :  { %1560 = vrot.lane.b32.xlu1 %v1463_v10, %s3328_s15 }
 0x9b7   :  { %v2876_v45 = vpop.f32.mrb[24].mxu1 }
 0x9b8   :  { %v4176_v48 = vadd.f32 %v2876_v45, %v2621_v27  ;;  %v1477_v31 = vpop.f32.mrb[25].mxu1 }
 0x9b9   :  { %v4180_v23 = vadd.f32 %v2621_v27, %v1477_v31 }
 0x9ba   :  { %1510 = vrot.lane.b32.xlu0 %v4176_v48, %s3328_s15 }
 0x9be   :  { %1508 = vrot.lane.b32.xlu0 %v4180_v23, %s3328_s15 }
 0x9c2   :  { %1528 = vrot.lane.b32.xlu0 %v1458_v24, %s3327_s2 }
 0x9c6   :  { %1530 = vrot.lane.b32.xlu0 %v1463_v10, %s3327_s2 }
 0xa07   :  { %v1495_v51 = vpop.permute.xlu1 %1494  ;;  %v1549_v19 = vpop.permute.xlu0 %1548 }
 0xa08   :  { %v1515_v9 = vsel %vm102_vm0, %v1495_v51, %v1463_v10  ;;  %v1565_v43 = vsel %vm102_vm0, %v1453_v8, %v1549_v19 }
 0xa0b   :  { %v4186_v11 = vpop.permute.xlu1 %1522  ;;  %v1547_v57 = vpop.permute.xlu0 %1546 }
 0xa0c   :  { %v1564_v14 = vsel %vm102_vm0, %v1448_v7, %v1547_v57  ;;  %v1569_v54 = vsel %vm441_vm2, %v1565_v43, %v4186_v11 }
 0xa0d   :  { %v1573_v15 = vsel %vm444_vm3, %v1569_v54, %v1495_v51 }
 0xa0f   :  { %v1493_v13 = vpop.permute.xlu1 %1492 }
 0xa10   :  { %v1514_v50 = vsel %vm102_vm0, %v1493_v13, %v1458_v24 }
 0xa13   :  { %v1521_v3 = vpop.permute.xlu1 %1520  ;;  %v1553_v46 = vpop.permute.xlu0 %1552 }
 0xa14   :  { %v1568_v44 = vsel %vm441_vm2, %v1564_v14, %v1521_v3  ;;  %v1567_v59 = vsel %vm102_vm0, %v1463_v10, %v1553_v46 }
 0xa15   :  { %v1572_v25 = vsel %vm444_vm3, %v1568_v44, %v1493_v13 }
 0xa17   :  { %v1551_v20 = vpop.permute.xlu1 %1550 }
 0xa18   :  { %v1566_v37 = vsel %vm102_vm0, %v1458_v24, %v1551_v20 }
 0xa1b   :  { %v1559_v28 = vpop.permute.xlu1 %1558 }
 0xa1c   :  { %v1570_v34 = vsel %vm441_vm2, %v1566_v37, %v1559_v28 }
 0xa1f   :  { %v1503_v40 = vpop.permute.xlu1 %1502 }
 0xa20   :  { %v1501_v21 = vpop.permute.xlu0 %1500  ;;  %v1517_v52 = vsel %vm441_vm2, %v1515_v9, %v1503_v40 }
 0xa21   :  { %v1516_v55 = vsel %vm441_vm2, %v1514_v50, %v1501_v21 }
 0xa23   :  { %v1561_v22 = vpop.permute.xlu1 %1560 }
 0xa24   :  { %v1571_v6 = vsel %vm441_vm2, %v1567_v59, %v1561_v22 }
 0xa2c   :  { %v1511_v17 = vpop.permute.xlu0 %1510 }
 0xa2d   :  { %v1519_v49 = vsel %vm444_vm3, %v1517_v52, %v1511_v17 }
 0xa2e   :  { %v1577_v60 = vmul.f32 %v1573_v15, %v1519_v49 }
 0xa30   :  { %v1509_v53 = vpop.permute.xlu0 %1508 }
 0xa31   :  { %v1518_v16 = vsel %vm444_vm3, %v1516_v55, %v1509_v53 }
 0xa32   :  { %v1576_v32 = vmul.f32 %v1572_v25, %v1518_v16 }
 0xa34   :  { %2909 = vmatprep.mubr.f32.mxu0 %v1576_v32  ;;  %v1529_v38 = vpop.permute.xlu0 %1528 }
 0xa35   :  { %v4204_v1 = vsel %vm102_vm0, %v1521_v3, %v1529_v38  ;;  %v1574_v0 = vsel %vm444_vm3, %v1570_v34, %v1529_v38  ;;  %2910 = vmatmul.mubr.f32.vlgmr.msra.gmra.mrb[8].mxu0 %v1577_v60 }
 0xa36   :  { %v1578_v2 = vmul.f32 %v1574_v0, %v1518_v16 }
 0xa38   :  { %2912 = vmatprep.mubr.f32.mxu0 %v1578_v2  ;;  %v4209_v47 = vpop.permute.xlu0 %1530 }
 0xa39   :  { %v1575_v29 = vsel %vm444_vm3, %v1571_v6, %v4209_v47 }
 0xa3a   :  { %v1579_v62 = vmul.f32 %v1575_v29, %v1519_v49 }
 0xa3c   :  { %2913 = vmatmul.mubr.f32.gmra.mrb[10].mxu0 %v1579_v62 }
 0xb08   :  { %v2911_v26 = vpop.f32.mrb[8].mxu0 }
 0xb09   :  { %v4219_v27 = vadd.f32 %v2911_v26, %v1487_v4  ;;  %v1646_v61 = vpop.f32.mrb[9].mxu0 }
 0xb0a   :  { %v4221_v8 = vadd.f32 %v1646_v61, %v1486_v39 }
 0xb0b   :  { %1671 = vrot.lane.b32.xlu0 %v4219_v27, %s3329_s27 }
 0xb0c   :  { %1669 = vrot.lane.b32.xlu1 %v4221_v8, %s3329_s27 }
 0xb0f   :  { %1687 = vrot.lane.b32.xlu0 %v4219_v27, %s3330_s9  ;;  %v2914_v7 = vpop.f32.mrb[10].mxu0 }
 0xb10   :  { %1685 = vrot.lane.b32.xlu1 %v4221_v8, %s3330_s9  ;;  %v1656_v5 = vpop.f32.mrb[11].mxu0  ;;  %v4234_v10 = vadd.f32 %v2914_v7, %v1489_v18 }
 0xb11   :  { %v4243_v24 = vadd.f32 %v1656_v5, %v1488_v33 }
 0xb13   :  { %1703 = vrot.lane.b32.xlu0 %v4219_v27, %s3331_s0 }
 0xb14   :  { %1675 = vrot.lane.b32.xlu1 %v4234_v10, %s3329_s27 }
 0xb17   :  { %1701 = vrot.lane.b32.xlu0 %v4221_v8, %s3331_s0 }
 0xb18   :  { %1673 = vrot.lane.b32.xlu1 %v4243_v24, %s3329_s27 }
 0xb1b   :  { %1691 = vrot.lane.b32.xlu0 %v4234_v10, %s3330_s9 }
 0xb1c   :  { %1689 = vrot.lane.b32.xlu1 %v4243_v24, %s3330_s9 }
 0xb1f   :  { %1707 = vrot.lane.b32.xlu0 %v4234_v10, %s3331_s0 }
 0xb20   :  { %1705 = vrot.lane.b32.xlu1 %v4243_v24, %s3331_s0 }
 0xb7d   :  { %v1672_v12 = vpop.permute.xlu0 %1671 }
 0xb7e   :  { %v1670_v56 = vpop.permute.xlu1 %1669  ;;  %v1682_v31 = vmax.f32 %v4219_v27, %v1672_v12 }
 0xb7f   :  { %v1681_v3 = vmax.f32 %v4221_v8, %v1670_v56 }
 0xb81   :  { %v1688_v45 = vpop.permute.xlu0 %1687 }
 0xb82   :  { %v1686_v51 = vpop.permute.xlu1 %1685  ;;  %v1698_v13 = vmax.f32 %v1682_v31, %v1688_v45 }
 0xb83   :  { %v1697_v46 = vmax.f32 %v1681_v3, %v1686_v51 }
 0xb85   :  { %v1704_v19 = vpop.permute.xlu0 %1703 }
 0xb86   :  { %v1714_v57 = vmax.f32 %v1698_v13, %v1704_v19  ;;  %v1676_v20 = vpop.permute.xlu1 %1675 }
 0xb87   :  { %v1684_v14 = vmax.f32 %v4234_v10, %v1676_v20 }
 0xb88   :  { %1723 = vrot.lane.b32.xlu0 %v1714_v57, %s3332_s13 }
 0xb89   :  { %v1702_v28 = vpop.permute.xlu0 %1701 }
 0xb8a   :  { %v1713_v21 = vmax.f32 %v1697_v46, %v1702_v28  ;;  %v1674_v40 = vpop.permute.xlu1 %1673 }
 0xb8b   :  { %v1683_v54 = vmax.f32 %v4243_v24, %v1674_v40 }
 0xb8c   :  { %1735 = vrot.lane.b32.xlu0 %v1714_v57, %s3333_s25  ;;  %1721 = vrot.lane.b32.xlu1 %v1713_v21, %s3332_s13 }
 0xb8d   :  { %v1692_v17 = vpop.permute.xlu0 %1691 }
 0xb8e   :  { %v1690_v9 = vpop.permute.xlu1 %1689  ;;  %v1700_v43 = vmax.f32 %v1684_v14, %v1692_v17 }
 0xb8f   :  { %v1699_v55 = vmax.f32 %v1683_v54, %v1690_v9 }
 0xb90   :  { %1747 = vrot.lane.b32.xlu0 %v1714_v57, %s3334_s28  ;;  %1733 = vrot.lane.b32.xlu1 %v1713_v21, %s3333_s25 }
 0xb91   :  { %v1708_v44 = vpop.permute.xlu0 %1707 }
 0xb92   :  { %v1716_v50 = vmax.f32 %v1700_v43, %v1708_v44  ;;  %v1706_v52 = vpop.permute.xlu1 %1705 }
 0xb93   :  { %v1715_v49 = vmax.f32 %v1699_v55, %v1706_v52 }
 0xb94   :  { %1745 = vrot.lane.b32.xlu1 %v1713_v21, %s3334_s28  ;;  %1727 = vrot.lane.b32.xlu0 %v1716_v50, %s3332_s13 }
 0xb98   :  { %1725 = vrot.lane.b32.xlu1 %v1715_v49, %s3332_s13  ;;  %1739 = vrot.lane.b32.xlu0 %v1716_v50, %s3333_s25 }
 0xb9c   :  { %1737 = vrot.lane.b32.xlu1 %v1715_v49, %s3333_s25  ;;  %1751 = vrot.lane.b32.xlu0 %v1716_v50, %s3334_s28 }
 0xba0   :  { %1749 = vrot.lane.b32.xlu1 %v1715_v49, %s3334_s28 }
 0xbfa   :  { %v1724_v53 = vpop.permute.xlu0 %1723 }
 0xbfb   :  { %v1758_v15 = vsel %vm830_vm4, %v1714_v57, %v1724_v53 }
 0xbfe   :  { %v1722_v25 = vpop.permute.xlu1 %1721  ;;  %v1736_v16 = vpop.permute.xlu0 %1735 }
 0xbff   :  { %v1762_v32 = vsel %vm839_vm5, %v1758_v15, %v1736_v16  ;;  %v1757_v22 = vsel %vm830_vm4, %v1713_v21, %v1722_v25 }
 0xc02   :  { %v1734_v37 = vpop.permute.xlu1 %1733  ;;  %v1748_v60 = vpop.permute.xlu0 %1747 }
 0xc03   :  { %v1766_v34 = vsel %vm848_vm6, %v1762_v32, %v1748_v60  ;;  %v1761_v0 = vsel %vm839_vm5, %v1757_v22, %v1734_v37 }
 0xc04   :  { %v1770_v38 = vsub.f32 %v4219_v27, %v1766_v34 }
 0xc06   :  { %v1775_v2 = vmul.f32 1.442695, %v1770_v38  ;;  %v1746_v59 = vpop.permute.xlu1 %1745  ;;  %v1728_v6 = vpop.permute.xlu0 %1727 }
 0xc07   :  { %v1765_v29 = vsel %vm848_vm6, %v1761_v0, %v1746_v59  ;;  %v1760_v61 = vsel %vm830_vm4, %v1716_v50, %v1728_v6 }
 0xc08   :  { %3215 = vpow2.f32 %v1775_v2  ;;  %v1769_v62 = vsub.f32 %v4221_v8, %v1765_v29 }
 0xc0a   :  { %v1773_v4 = vmul.f32 1.442695, %v1769_v62  ;;  %v1726_v39 = vpop.permute.xlu1 %1725  ;;  %v1740_v26 = vpop.permute.xlu0 %1739 }
 0xc0b   :  { %v1764_v27 = vsel %vm839_vm5, %v1760_v61, %v1740_v26  ;;  %v1759_v12 = vsel %vm830_vm4, %v1715_v49, %v1726_v39 }
 0xc0c   :  { %3217 = vpow2.f32 %v1773_v4 }
 0xc0e   :  { %v1738_v18 = vpop.permute.xlu1 %1737  ;;  %v1752_v7 = vpop.permute.xlu0 %1751 }
 0xc0f   :  { %v1768_v5 = vsel %vm848_vm6, %v1764_v27, %v1752_v7  ;;  %v1763_v8 = vsel %vm839_vm5, %v1759_v12, %v1738_v18 }
 0xc10   :  { %v1772_v33 = vsub.f32 %v4234_v10, %v1768_v5 }
 0xc12   :  { %v4286_v56 = vpop.eup %3215  ;;  %v1779_v45 = vmul.f32 1.442695, %v1772_v33  ;;  %v1750_v31 = vpop.permute.xlu1 %1749 }
 0xc13   :  { %v1767_v51 = vsel %vm848_vm6, %v1763_v8, %v1750_v31  ;;  %1787 = vrot.lane.b32.xlu0 %v4286_v56, %s3329_s27 }
 0xc14   :  { %3219 = vpow2.f32 %v1779_v45  ;;  %v1771_v13 = vsub.f32 %v4243_v24, %v1767_v51 }
 0xc16   :  { %v4293_v19 = vpop.eup %3217  ;;  %v1777_v3 = vmul.f32 1.442695, %v1771_v13 }
 0xc17   :  { %1785 = vrot.lane.b32.xlu1 %v4293_v19, %s3329_s27  ;;  %1803 = vrot.lane.b32.xlu0 %v4286_v56, %s3330_s9 }
 0xc18   :  { %3221 = vpow2.f32 %v1777_v3 }
 0xc1b   :  { %1801 = vrot.lane.b32.xlu1 %v4293_v19, %s3330_s9  ;;  %1819 = vrot.lane.b32.xlu0 %v4286_v56, %s3331_s0 }
 0xc1e   :  { %v4303_v10 = vpop.eup %3219 }
 0xc1f   :  { %1817 = vrot.lane.b32.xlu0 %v4293_v19, %s3331_s0  ;;  %1791 = vrot.lane.b32.xlu1 %v4303_v10, %s3329_s27 }
 0xc22   :  { %v4309_v24 = vpop.eup %3221 }
 0xc23   :  { %1807 = vrot.lane.b32.xlu0 %v4303_v10, %s3330_s9  ;;  %1789 = vrot.lane.b32.xlu1 %v4309_v24, %s3329_s27 }
 0xc27   :  { %1823 = vrot.lane.b32.xlu0 %v4303_v10, %s3331_s0  ;;  %1805 = vrot.lane.b32.xlu1 %v4309_v24, %s3330_s9 }
 0xc2b   :  { %1821 = vrot.lane.b32.xlu1 %v4309_v24, %s3331_s0 }
 0xc85   :  { %v1788_v57 = vpop.permute.xlu0 %1787 }
 0xc86   :  { %v1798_v28 = vadd.f32 %v4286_v56, %v1788_v57 }
 0xc89   :  { %v1786_v20 = vpop.permute.xlu1 %1785  ;;  %v1804_v46 = vpop.permute.xlu0 %1803 }
 0xc8a   :  { %v1814_v21 = vadd.f32 %v1804_v46, %v1798_v28  ;;  %v1797_v14 = vadd.f32 %v4293_v19, %v1786_v20 }
 0xc8d   :  { %v1802_v40 = vpop.permute.xlu1 %1801  ;;  %v1820_v17 = vpop.permute.xlu0 %1819 }
 0xc8e   :  { %v1830_v9 = vadd.f32 %v1820_v17, %v1814_v21  ;;  %v1813_v43 = vadd.f32 %v1802_v40, %v1797_v14  ;;  %v1541_v21 = vsel %vm102_vm0, %v4186_v11, %v4209_v47 }
 0xc8f   :  { %v1543_v14 = vsel %vm441_vm2, %v1541_v21, %v4167_v30  ;;  %v2066_v30 = vld [vmem:[%s4599_s5] sm:$0xff]  ;;  %v4427_v21 = vld [vmem:[#allocation5] sm:$0x7f] }
 0xc90   :  { %3223 = vrcp.f32 %v1830_v9 }
 0xc91   :  { %v1792_v44 = vpop.permute.xlu1 %1791  ;;  %v1818_v54 = vpop.permute.xlu0 %1817 }
 0xc92   :  { %v1829_v50 = vadd.f32 %v1818_v54, %v1813_v43  ;;  %v1800_v49 = vadd.f32 %v4303_v10, %v1792_v44 }
 0xc94   :  { %3225 = vrcp.f32 %v1829_v50 }
 0xc95   :  { %v1790_v52 = vpop.permute.xlu1 %1789  ;;  %v1808_v55 = vpop.permute.xlu0 %1807 }
 0xc96   :  { %v1816_v53 = vadd.f32 %v1808_v55, %v1800_v49  ;;  %v1799_v32 = vadd.f32 %v4309_v24, %v1790_v52 }
 0xc99   :  { %v1806_v25 = vpop.permute.xlu1 %1805  ;;  %v1824_v16 = vpop.permute.xlu0 %1823 }
 0xc9a   :  { %v3224_v15 = vpop.eup %3223  ;;  %v1832_v37 = vadd.f32 %v1824_v16, %v1816_v53  ;;  %v1815_v60 = vadd.f32 %v1806_v25, %v1799_v32  ;;  %v2069_v53 = vld [vmem:[%s4599_s5 + $0x18] sm:$0xff]  ;;  %v2070_v16 = vld [vmem:[%s4599_s5 + $0x20] sm:$0xff] }
 0xc9b   :  { %1843 = vrot.lane.b32.xlu0 %v3224_v15, %s3332_s13 }
 0xc9c   :  { %3227 = vrcp.f32 %v1832_v37  ;;  %v2072_v37 = vld [vmem:[%s4599_s5 + $0x30] sm:$0xff] }
 0xc9d   :  { %v1822_v34 = vpop.permute.xlu1 %1821 }
 0xc9e   :  { %v3226_v38 = vpop.eup %3225  ;;  %v1831_v22 = vadd.f32 %v1822_v34, %v1815_v60  ;;  %v2073_v60 = vld [vmem:[%s4599_s5 + $0x38] sm:$0xff] }
 0xc9f   :  { %1855 = vrot.lane.b32.xlu0 %v3224_v15, %s3333_s25  ;;  %1841 = vrot.lane.b32.xlu1 %v3226_v38, %s3332_s13  ;;  %v3105_v34 = vpack.c.bf16 %v2073_v60, %v2072_v37 }
 0xca0   :  { %3229 = vrcp.f32 %v1831_v22 }
 0xca3   :  { %1867 = vrot.lane.b32.xlu0 %v3224_v15, %s3334_s28  ;;  %1853 = vrot.lane.b32.xlu1 %v3226_v38, %s3333_s25 }
 0xca6   :  { %v3228_v0 = vpop.eup %3227 }
 0xca7   :  { %1865 = vrot.lane.b32.xlu1 %v3226_v38, %s3334_s28  ;;  %1847 = vrot.lane.b32.xlu0 %v3228_v0, %s3332_s13 }
 0xcaa   :  { %v3230_v2 = vpop.eup %3229 }
 0xcab   :  { %1845 = vrot.lane.b32.xlu1 %v3230_v2, %s3332_s13  ;;  %1859 = vrot.lane.b32.xlu0 %v3228_v0, %s3333_s25 }
 0xcaf   :  { %1857 = vrot.lane.b32.xlu1 %v3230_v2, %s3333_s25  ;;  %1871 = vrot.lane.b32.xlu0 %v3228_v0, %s3334_s28 }
 0xcb3   :  { %1869 = vrot.lane.b32.xlu1 %v3230_v2, %s3334_s28  ;;  %1536 = vrot.lane.b32.xlu0 %v4176_v48, %s3326_s26 }
 0xcb7   :  { %1534 = vrot.lane.b32.xlu1 %v4180_v23, %s3326_s26 }
 0xd0d   :  { %v1844_v59 = vpop.permute.xlu0 %1843 }
 0xd0e   :  { %v1878_v39 = vsel %vm830_vm4, %v3224_v15, %v1844_v59  ;;  %v2071_v15 = vld [vmem:[%s4599_s5 + $0x28] sm:$0xff] }
 0xd0f   :  { %v3101_v32 = vpack.c.bf16 %v2071_v15, %v2070_v16 }
 0xd11   :  { %v1842_v6 = vpop.permute.xlu1 %1841  ;;  %v1856_v29 = vpop.permute.xlu0 %1855 }
 0xd12   :  { %v1877_v26 = vsel %vm830_vm4, %v3226_v38, %v1842_v6  ;;  %v1882_v61 = vsel %vm839_vm5, %v1878_v39, %v1856_v29 }
 0xd15   :  { %v1854_v62 = vpop.permute.xlu1 %1853  ;;  %v1868_v4 = vpop.permute.xlu0 %1867 }
 0xd16   :  { %v1881_v27 = vsel %vm839_vm5, %v1877_v26, %v1854_v62  ;;  %v1886_v18 = vsel %vm848_vm6, %v1882_v61, %v1868_v4 }
 0xd17   :  { %v1890_v33 = vmul.f32 %v4286_v56, %v1886_v18  ;;  %v3248_v18 = vld [vmem:[%s4595_s1] sm:$0xff] }
 0xd19   :  { %v1866_v7 = vpop.permute.xlu1 %1865  ;;  %v1848_v48 = vpop.permute.xlu0 %1847 }
 0xd1a   :  { %v1885_v5 = vsel %vm848_vm6, %v1881_v27, %v1866_v7  ;;  %v1880_v51 = vsel %vm830_vm4, %v3228_v0, %v1848_v48  ;;  %v3247_v27 = vld [vmem:[%s4595_s1 + $0x8] sm:$0xff] }
 0xd1b   :  { %v1889_v23 = vmul.f32 %v4293_v19, %v1885_v5 }
 0xd1d   :  { %2919 = vmatprep.mubr.msk.f32.mxu1 %vm192_vm1, %v1889_v23  ;;  %v1846_v12 = vpop.permute.xlu1 %1845  ;;  %v1860_v8 = vpop.permute.xlu0 %1859 }
 0xd1e   :  { %2920 = vmatmul.mubr.msk.f32.vlgmr.msra.gmra.mrb[26].mxu1 %vm192_vm1, %v1890_v33  ;;  %v1879_v13 = vsel %vm830_vm4, %v3230_v2, %v1846_v12  ;;  %v1884_v3 = vsel %vm839_vm5, %v1880_v51, %v1860_v8 }
 0xd21   :  { %v1858_v45 = vpop.permute.xlu1 %1857  ;;  %v1872_v31 = vpop.permute.xlu0 %1871 }
 0xd22   :  { %v1883_v57 = vsel %vm839_vm5, %v1879_v13, %v1858_v45  ;;  %v1888_v19 = vsel %vm848_vm6, %v1884_v3, %v1872_v31 }
 0xd23   :  { %v1892_v28 = vmul.f32 %v4303_v10, %v1888_v19  ;;  %v1542_v10 = vsel %vm441_vm2, %v4204_v1, %v4169_v42  ;;  %v2067_v42 = vld [vmem:[%s4599_s5 + $0x8] sm:$0xff]  ;;  %v2068_v1 = vld [vmem:[%s4599_s5 + $0x10] sm:$0xff] }
 0xd24   :  { %v3093_v49 = vpack.c.bf16 %v2067_v42, %v2066_v30  ;;  %v3097_v25 = vpack.c.bf16 %v2069_v53, %v2068_v1 }
 0xd25   :  { %v1870_v20 = vpop.permute.xlu1 %1869  ;;  %v1537_v40 = vpop.permute.xlu0 %1536 }
 0xd26   :  { %v1887_v56 = vsel %vm848_vm6, %v1883_v57, %v1870_v20  ;;  %v1545_v9 = vsel %vm444_vm3, %v1543_v14, %v1537_v40  ;;  %3094 = vmatprep.subr.bf16.mxu1 %v3093_v49  ;;  %v3249_v40 = vld [vmem:[%s4613_s21 + $0x8] sm:$0xff]  ;;  %v2160_v14 = vrot.slane %v4427_v21, %v132_v58 }
 0xd27   :  { %v1891_v46 = vmul.f32 %v4309_v24, %v1887_v56  ;;  %3096 = vmatpush3.bf16.msra.mxu1 %v3093_v49 }
 0xd28   :  { %3098 = vmatprep.subr.bf16.mxu1 %v3097_v25 }
 0xd29   :  { %2922 = vmatprep.mubr.msk.f32.mxu1 %vm192_vm1, %v1891_v46  ;;  %v1535_v17 = vpop.permute.xlu1 %1534 }
 0xd2a   :  { %2923 = vmatmul.mubr.msk.f32.gmra.mrb[28].mxu1 %vm192_vm1, %v1892_v28  ;;  %v1544_v44 = vsel %vm444_vm3, %v1542_v10, %v1535_v17 }
 0xd2b   :  { %3100 = vmatpush3.bf16.msra.mxu1 %v3097_v25 }
 0xd2c   :  { %3102 = vmatprep.subr.bf16.mxu1 %v3101_v32 }
 0xd2f   :  { %3104 = vmatpush3.bf16.msra.mxu1 %v3101_v32 }
 0xd30   :  { %3106 = vmatprep.subr.bf16.mxu1 %v3105_v34 }
 0xd33   :  { %3108 = vmatpush3.bf16.msra.mxu1 %v3105_v34 }
 0xdf1   :  { %v2921_v43 = vpop.f32.mrb[26].mxu1 }
 0xdf2   :  { %v4370_v24 = vmul.f32 %v2921_v43, %v1545_v9  ;;  %v1971_v54 = vpop.f32.mrb[27].mxu1 }
 0xdf3   :  { %v1990_v50 = vmul.f32 %v1971_v54, %v1544_v44 }
 0xdfd   :  { %v2924_v52 = vpop.f32.mrb[28].mxu1 }
 0xdfe   :  { %v1993_v11 = vmul.f32 %v2924_v52, %v1545_v9  ;;  %v1981_v47 = vpop.f32.mrb[29].mxu1  ;;  %v3250_v9 = vld [vmem:[%s4613_s21] sm:$0xff] }
 0xdff   :  { %v1992_v55 = vmul.f32 %v1981_v47, %v1544_v44 }
 0xe00   :  { %2004 = vrot.lane.b32.xlu0 %v1993_v11, %s3327_s2 }
 0xe01   :  { %2002 = vrot.lane.b32.xlu1 %v1992_v55, %s3327_s2 }
 0xe04   :  { %2020 = vrot.lane.b32.xlu0 %v1993_v11, %s3328_s15 }
 0xe05   :  { %2018 = vrot.lane.b32.xlu1 %v1992_v55, %s3328_s15 }
 0xe08   :  { %2036 = vrot.lane.b32.xlu0 %v1993_v11, %s3326_s26 }
 0xe09   :  { %2034 = vrot.lane.b32.xlu1 %v1992_v55, %s3326_s26 }
 0xe0c   :  { %2000 = vrot.lane.b32.xlu0 %v4370_v24, %s3327_s2 }
 0xe0d   :  { %1998 = vrot.lane.b32.xlu1 %v1990_v50, %s3327_s2 }
 0xe10   :  { %2016 = vrot.lane.b32.xlu0 %v4370_v24, %s3328_s15 }
 0xe11   :  { %2014 = vrot.lane.b32.xlu1 %v1990_v50, %s3328_s15 }
 0xe14   :  { %2032 = vrot.lane.b32.xlu0 %v4370_v24, %s3326_s26 }
 0xe15   :  { %2030 = vrot.lane.b32.xlu1 %v1990_v50, %s3326_s26 }
 0xe72   :  { %v2005_v38 = vpop.permute.xlu0 %2004 }
 0xe73   :  { %v2003_v22 = vpop.permute.xlu1 %2002  ;;  %v2013_v2 = vadd.f32 %v2005_v38, %v1993_v11 }
 0xe74   :  { %v2012_v6 = vadd.f32 %v2003_v22, %v1992_v55 }
 0xe76   :  { %v2021_v0 = vpop.permute.xlu0 %2020 }
 0xe77   :  { %v2019_v59 = vpop.permute.xlu1 %2018  ;;  %v2029_v29 = vadd.f32 %v2021_v0, %v2013_v2 }
 0xe78   :  { %v2028_v62 = vadd.f32 %v2019_v59, %v2012_v6 }
 0xe7a   :  { %v2037_v4 = vpop.permute.xlu0 %2036 }
 0xe7b   :  { %v2045_v39 = vadd.f32 %v2037_v4, %v2029_v29  ;;  %v2035_v26 = vpop.permute.xlu1 %2034 }
 0xe7c   :  { %v2044_v61 = vadd.f32 %v2035_v26, %v2028_v62 }
 0xe7d   :  { %2050 = vrot.lane.b32.xlu0 %v2045_v39, %s3326_s26 }
 0xe7e   :  { %2048 = vrot.lane.b32.xlu1 %v2044_v61, %s3326_s26  ;;  %v2001_v7 = vpop.permute.xlu0 %2000 }
 0xe7f   :  { %v1999_v48 = vpop.permute.xlu1 %1998  ;;  %v2011_v8 = vadd.f32 %v2001_v7, %v4370_v24 }
 0xe80   :  { %v2010_v33 = vadd.f32 %v1999_v48, %v1990_v50  ;;  %v2247_v48 = vld [vmem:[%s4600_s6 + $0x10] sm:$0xff] }
 0xe81   :  { %2060 = vrot.lane.b32.xlu0 %v3247_v27, %s3326_s26  ;;  %v2245_v27 = vld [vmem:[%s4600_s6] sm:$0xff] }
 0xe82   :  { %2058 = vrot.lane.b32.xlu1 %v3248_v18, %s3326_s26  ;;  %v2017_v5 = vpop.permute.xlu0 %2016  ;;  %v2246_v18 = vld [vmem:[%s4600_s6 + $0x8] sm:$0xff] }
 0xe83   :  { %v2015_v23 = vpop.permute.xlu1 %2014  ;;  %v2027_v51 = vadd.f32 %v2017_v5, %v2011_v8  ;;  %v3109_v7 = vpack.c.bf16 %v2246_v18, %v2245_v27  ;;  %v2248_v5 = vld [vmem:[%s4600_s6 + $0x18] sm:$0xff] }
 0xe84   :  { %v2026_v31 = vadd.f32 %v2015_v23, %v2010_v33  ;;  %v3113_v23 = vpack.c.bf16 %v2248_v5, %v2247_v48  ;;  %v2249_v33 = vld [vmem:[%s4600_s6 + $0x20] sm:$0xff] }
 0xe85   :  { %3110 = vmatprep.subr.bf16.mxu0 %v3109_v7 }
 0xe86   :  { %v2033_v12 = vpop.permute.xlu0 %2032  ;;  %3112 = vmatpush3.bf16.msra.mxu0 %v3109_v7 }
 0xe87   :  { %v2031_v45 = vpop.permute.xlu1 %2030  ;;  %v2043_v57 = vadd.f32 %v2033_v12, %v2027_v51  ;;  %3114 = vmatprep.subr.bf16.mxu0 %v3113_v23  ;;  %v2250_v12 = vld [vmem:[%s4600_s6 + $0x28] sm:$0xff] }
 0xe88   :  { %v2042_v13 = vadd.f32 %v2031_v45, %v2026_v31  ;;  %v3117_v8 = vpack.c.bf16 %v2250_v12, %v2249_v33  ;;  %v2251_v45 = vld [vmem:[%s4600_s6 + $0x30] sm:$0xff]  ;;  %v2252_v31 = vld [vmem:[%s4600_s6 + $0x38] sm:$0xff] }
 0xe89   :  { %v3121_v51 = vpack.c.bf16 %v2252_v31, %v2251_v45 }
 0xe8a   :  { %3116 = vmatpush3.bf16.msra.mxu0 %v3113_v23 }
 0xe8b   :  { %3118 = vmatprep.subr.bf16.mxu0 %v3117_v8 }
 0xe8e   :  { %3120 = vmatpush3.bf16.msra.mxu0 %v3117_v8 }
 0xe8f   :  { %3122 = vmatprep.subr.bf16.mxu0 %v3121_v51 }
 0xe92   :  { %3124 = vmatpush3.bf16.msra.mxu0 %v3121_v51 }
 0xeef   :  { %v2051_v3 = vpop.permute.xlu0 %2050 }
 0xef0   :  { %v2049_v19 = vpop.permute.xlu1 %2048  ;;  %v2055_v56 = vsel %vm102_vm0, %v2043_v57, %v2051_v3 }
 0xef1   :  { %v2054_v20 = vsel %vm102_vm0, %v2042_v13, %v2049_v19 }
 0xef2   :  { %2941 = vmatprep.mubr.msk.f32.mxu1 %vm441_vm2, %v2054_v20 }
 0xef3   :  { %2942 = vmatmul.mubr.msk.f32.vlgmr.msra.gmra.mrb[30].mxu1 %vm441_vm2, %v2055_v56  ;;  %v2061_v46 = vpop.permute.xlu0 %2060 }
 0xef4   :  { %v2059_v28 = vpop.permute.xlu1 %2058  ;;  %v2065_v17 = vsel %vm102_vm0, %v3249_v40, %v2061_v46 }
 0xef5   :  { %v2064_v43 = vsel %vm102_vm0, %v3250_v9, %v2059_v28 }
 0xfc6   :  { %v2943_v10 = vpop.f32.mrb[30].mxu1 }
 0xfc7   :  { %v2156_v24 = vadd.f32 %v2943_v10, %v2065_v17  ;;  %v2146_v44 = vpop.f32.mrb[31].mxu1 }
 0xfc8   :  { %v2155_v54 = vadd.f32 %v2146_v44, %v2064_v43 }
 0xfc9   :  { %v4440_v50 = vadd.f32 %v2160_v14, %v2156_v24  ;;  %v2236_v24 = vrot.slane %v4427_v21, %v138_v63 }
 0xfca   :  { %v4442_v52 = vadd.f32 %v2160_v14, %v2155_v54 }
 0xfcb   :  { %2193 = vrot.lane.b32.xlu0 %v4440_v50, %s3327_s2  ;;  %v2166_v42 = vsel %vm102_vm0, %v4440_v50, 0.0 }
 0xfcc   :  { %2191 = vrot.lane.b32.xlu1 %v4442_v52, %s3327_s2  ;;  %v2163_v30 = vsel %vm102_vm0, %v4442_v52, 0.0 }
0x103d   :  { %v2194_v58 = vpop.permute.xlu0 %2193 }
0x103e   :  { %v2200_v11 = vsel %vm102_vm0, %v2194_v58, 0.0  ;;  %v2192_v47 = vpop.permute.xlu1 %2191 }
0x103f   :  { %v2197_v55 = vsel %vm102_vm0, %v2192_v47, 0.0  ;;  %2201 = vadd.xlane.f32.xlu0 %v2200_v11  ;;  %v2242_v11 = vrot.slane %v4427_v21, %v170_v36  ;;  %v2356_v36 = vld [vmem:[%s4601_s7] sm:$0xff] }
0x1040   :  { %2198 = vadd.xlane.f32.xlu1 %v2197_v55 }
0x1043   :  { %2164 = vadd.xlane.f32.xlu0 %v2163_v30 }
0x1047   :  { %2167 = vadd.xlane.f32.xlu0 %v2166_v42 }
0x10cc   :  { %v2202_v1 = vpop.xlane.xlu0 %2201 }
0x10cd   :  { %v2204_v49 = vmul.f32 0.03125, %v2202_v1  ;;  %v2199_v53 = vpop.xlane.xlu1 %2198 }
0x10ce   :  { %v2203_v25 = vmul.f32 0.03125, %v2199_v53 }
0x10cf   :  { %v4455_v16 = vsub.f32 %v4440_v50, %v2204_v49 }
0x10d0   :  { %v4458_v15 = vsub.f32 %v4442_v52, %v2203_v25  ;;  %v2165_v60 = vpop.xlane.xlu0 %2164 }
0x10d1   :  { %v2208_v32 = vmul.f32 %v4455_v16, %v4455_v16  ;;  %v2169_v34 = vmul.f32 0.03125, %v2165_v60 }
0x10d2   :  { %v2207_v37 = vmul.f32 %v4458_v15, %v4458_v15 }
0x10d3   :  { %2213 = vrot.lane.b32.xlu0 %v2208_v32, %s3327_s2  ;;  %v2171_v22 = vsub.f32 %v4442_v52, %v2169_v34  ;;  %v2360_v34 = vld [vmem:[%s4601_s7 + $0x20] sm:$0xff] }
0x10d4   :  { %2211 = vrot.lane.b32.xlu1 %v2207_v37, %s3327_s2  ;;  %v2168_v38 = vpop.xlane.xlu0 %2167  ;;  %v2359_v37 = vld [vmem:[%s4601_s7 + $0x18] sm:$0xff] }
0x10d5   :  { %v2170_v0 = vmul.f32 0.03125, %v2168_v38  ;;  %v2173_v59 = vmul.f32 %v2171_v22, %v2171_v22  ;;  %v2361_v38 = vld [vmem:[%s4601_s7 + $0x28] sm:$0xff] }
0x10d7   :  { %v2172_v2 = vsub.f32 %v4440_v50, %v2170_v0  ;;  %v2175_v6 = vsel %vm102_vm0, %v2173_v59, 0.0  ;;  %v2362_v0 = vld [vmem:[%s4601_s7 + $0x30] sm:$0xff] }
0x10d9   :  { %v2174_v29 = vmul.f32 %v2172_v2, %v2172_v2 }
0x10db   :  { %v2178_v62 = vsel %vm102_vm0, %v2174_v29, 0.0 }
0x10f8   :  { %2176 = vadd.xlane.f32.xlu1 %v2175_v6  ;;  %v2256_v6 = vrot.slane %v4427_v21, %v176_v41 }
0x10fc   :  { %2179 = vadd.xlane.f32.xlu1 %v2178_v62 }
0x1145   :  { %v2214_v26 = vpop.permute.xlu0 %2213 }
0x1146   :  { %v2212_v4 = vpop.permute.xlu1 %2211  ;;  %v2220_v61 = vsel %vm102_vm0, %v2214_v26, 0.0 }
0x1147   :  { %v2217_v39 = vsel %vm102_vm0, %v2212_v4, 0.0 }
0x1148   :  { %2218 = vadd.xlane.f32.xlu0 %v2217_v39 }
0x114c   :  { %2221 = vadd.xlane.f32.xlu0 %v2220_v61 }
0x1185   :  { %v2177_v13 = vpop.xlane.xlu1 %2176 }
0x1186   :  { %v2181_v3 = vmul.f32 0.03125, %v2177_v13 }
0x1188   :  { %v2183_v19 = vadd.f32 1e-05, %v2181_v3 }
0x1189   :  { %v2180_v57 = vpop.xlane.xlu1 %2179 }
0x118a   :  { %v2182_v20 = vmul.f32 0.03125, %v2180_v57  ;;  %3231 = vrsqrt.f32 %v2183_v19  ;;  %v2366_v19 = vsub.s32 4, %v3466_v35 }
0x118c   :  { %v2184_v28 = vadd.f32 1e-05, %v2182_v20  ;;  %v2367_v20 = vrot.slane %v4427_v21, %v2366_v19 }
0x1194   :  { %v3232_v43 = vpop.eup %3231 }
0x1195   :  { %v2187_v44 = vmul.f32 %v3232_v43, %v2171_v22  ;;  %v3133_v22 = vpack.c.bf16 %v2361_v38, %v2360_v34 }
0x11d5   :  { %v2219_v56 = vpop.xlane.xlu0 %2218 }
0x11d6   :  { %v2223_v46 = vmul.f32 0.03125, %v2219_v56 }
0x11d8   :  { %v2225_v40 = vadd.f32 1e-05, %v2223_v46 }
0x11d9   :  { %v2222_v17 = vpop.xlane.xlu0 %2221 }
0x11da   :  { %3233 = vrsqrt.f32 %v2225_v40  ;;  %v2224_v14 = vmul.f32 0.03125, %v2222_v17 }
0x11db   :  { %3235 = vrsqrt.f32 %v2184_v28 }
0x11dc   :  { %v2226_v9 = vadd.f32 1e-05, %v2224_v14 }
0x11de   :  { %3237 = vrsqrt.f32 %v2226_v9 }
0x11e4   :  { %v3234_v10 = vpop.eup %3233 }
0x11e5   :  { %v2229_v54 = vmul.f32 %v3234_v10, %v4458_v15  ;;  %v3236_v58 = vpop.eup %3235  ;;  %v2357_v15 = vld [vmem:[%s4601_s7 + $0x8] sm:$0xff] }
0x11e6   :  { %v2188_v42 = vmul.f32 %v3236_v58, %v2172_v2  ;;  %v3125_v32 = vpack.c.bf16 %v2357_v15, %v2356_v36  ;;  %v2363_v2 = vld [vmem:[%s4601_s7 + $0x38] sm:$0xff]  ;;  %v2495_v36 = vld [vmem:[%s4602_s8 + $0x28] sm:$0xff] }
0x11e7   :  { %v2231_v47 = vsel %vm102_vm0, %v2187_v44, %v2229_v54  ;;  %v3137_v59 = vpack.c.bf16 %v2363_v2, %v2362_v0 }
0x11e8   :  { %v3238_v55 = vpop.eup %3237  ;;  %v2237_v30 = vmul.f32 %v2236_v24, %v2231_v47  ;;  %3126 = vmatprep.subr.bf16.mxu1 %v3125_v32 }
0x11e9   :  { %v2230_v1 = vmul.f32 %v3238_v55, %v4455_v16  ;;  %3128 = vmatpush3.bf16.msra.mxu1 %v3125_v32  ;;  %v2358_v16 = vld [vmem:[%s4601_s7 + $0x10] sm:$0xff] }
0x11ea   :  { %v2243_v49 = vadd.f32 %v2242_v11, %v2237_v30  ;;  %v3129_v60 = vpack.c.bf16 %v2359_v37, %v2358_v16  ;;  %v2496_v32 = vld [vmem:[%s4602_s8 + $0x30] sm:$0xff]  ;;  %v2497_v16 = vld [vmem:[%s4602_s8 + $0x38] sm:$0xff] }
0x11eb   :  { %v2232_v53 = vsel %vm102_vm0, %v2188_v42, %v2230_v1  ;;  %v2491_v42 = vld [vmem:[%s4602_s8 + $0x8] sm:$0xff]  ;;  %v3153_v37 = vpack.c.bf16 %v2497_v16, %v2496_v32 }
0x11ec   :  { %v2238_v25 = vmul.f32 %v2236_v24, %v2232_v53  ;;  %2960 = vmatprep.mubr.msk.f32.mxu0 %vm441_vm2, %v2243_v49  ;;  %3130 = vmatprep.subr.bf16.mxu1 %v3129_v60  ;;  %v2492_v49 = vld [vmem:[%s4602_s8 + $0x10] sm:$0xff]  ;;  %v2493_v53 = vld [vmem:[%s4602_s8 + $0x18] sm:$0xff] }
0x11ed   :  { %3132 = vmatpush3.bf16.msra.mxu1 %v3129_v60 }
0x11ee   :  { %v2244_v63 = vadd.f32 %v2242_v11, %v2238_v25  ;;  %3134 = vmatprep.subr.bf16.mxu1 %v3133_v22  ;;  %v3145_v25 = vpack.c.bf16 %v2493_v53, %v2492_v49 }
0x11f0   :  { %2961 = vmatmul.mubr.msk.f32.vlgmr.msra.gmra.mrb[12].mxu0 %vm441_vm2, %v2244_v63  ;;  %v2494_v63 = vld [vmem:[%s4602_s8 + $0x20] sm:$0xff] }
0x11f1   :  { %3136 = vmatpush3.bf16.msra.mxu1 %v3133_v22  ;;  %v3149_v15 = vpack.c.bf16 %v2495_v36, %v2494_v63 }
0x11f2   :  { %3138 = vmatprep.subr.bf16.mxu1 %v3137_v59 }
0x11f5   :  { %3140 = vmatpush3.bf16.msra.mxu1 %v3137_v59  ;;  %v2480_v59 = vsub.s32 5, %v3466_v35 }
0x12c3   :  { %v2962_v29 = vpop.f32.mrb[12].mxu0 }
0x12c4   :  { %v2335_v62 = vadd.f32 %v2962_v29, %v2256_v6  ;;  %v2329_v4 = vpop.f32.mrb[13].mxu0  ;;  %v2481_v29 = vrot.slane %v4427_v21, %v2480_v59 }
0x12c5   :  { %v2330_v39 = vadd.f32 %v2329_v4, %v2256_v6  ;;  %v2486_v6 = vsub.s32 6, %v3466_v35 }
0x12c6   :  { %v2339_v26 = vmul.f32 %v2335_v62, %v2335_v62 }
0x12c7   :  { %v2338_v61 = vmul.f32 %v2330_v39, %v2330_v39 }
0x12c8   :  { %v2341_v27 = vmul.f32 %v2339_v26, %v2335_v62 }
0x12c9   :  { %v2340_v18 = vmul.f32 %v2338_v61, %v2330_v39  ;;  %v2487_v61 = vrot.slane %v4427_v21, %v2486_v6 }
0x12ca   :  { %v2343_v7 = vmul.f32 0.044715, %v2341_v27 }
0x12cb   :  { %v2342_v48 = vmul.f32 0.044715, %v2340_v18 }
0x12cc   :  { %v2345_v5 = vadd.f32 %v2343_v7, %v2335_v62 }
0x12cd   :  { %v2344_v23 = vadd.f32 %v2342_v48, %v2330_v39 }
0x12ce   :  { %v2347_v33 = vmul.f32 0.7978846, %v2345_v5  ;;  %v3251_v5 = vld [vmem:[#allocation2] sm:$0x1f] }
0x12cf   :  { %v2346_v12 = vmul.f32 0.7978846, %v2344_v23  ;;  %v2501_v23 = vrot.slane %v3251_v5, %v2366_v19 }
0x12d0   :  { %3239 = vtanh.f32 %v2347_v33 }
0x12d1   :  { %3241 = vtanh.f32 %v2346_v12 }
0x12da   :  { %v3240_v8 = vpop.eup %3239 }
0x12db   :  { %v3242_v45 = vpop.eup %3241  ;;  %v2351_v31 = vadd.f32 1.0, %v3240_v8 }
0x12dc   :  { %v2350_v41 = vadd.f32 1.0, %v3242_v45 }
0x12dd   :  { %v2353_v51 = vmul.f32 0.5, %v2351_v31 }
0x12de   :  { %v2352_v13 = vmul.f32 0.5, %v2350_v41 }
0x12df   :  { %v2355_v57 = vmul.f32 %v2353_v51, %v2335_v62 }
0x12e0   :  { %v2354_v3 = vmul.f32 %v2352_v13, %v2330_v39 }
0x12e2   :  { %2979 = vmatprep.mubr.msk.f32.mxu1 %vm441_vm2, %v2354_v3 }
0x12e3   :  { %2980 = vmatmul.mubr.msk.f32.vlgmr.msra.gmra.mrb[32].mxu1 %vm441_vm2, %v2355_v57 }
0x13b6   :  { %v2981_v56 = vpop.f32.mrb[32].mxu1 }
0x13b7   :  { %v2446_v46 = vadd.f32 %v2981_v56, %v2367_v20  ;;  %v2440_v28 = vpop.f32.mrb[33].mxu1 }
0x13b8   :  { %v2441_v40 = vadd.f32 %v2440_v28, %v2367_v20 }
0x13b9   :  { %v2450_v17 = vadd.f32 %v2446_v46, %v4440_v50 }
0x13ba   :  { %v2449_v14 = vadd.f32 %v2441_v40, %v4442_v52  ;;  %v2490_v52 = vld [vmem:[%s4602_s8] sm:$0xff]  ;;  %s3335_s8 = smov [#allocation7]  }
0x13bb   :  { %v2454_v9 = vsel %vm441_vm2, %v2450_v17, 0.0  ;;  %v3141_v1 = vpack.c.bf16 %v2491_v42, %v2490_v52  ;;  %s2590_s15 = sshll.u32 %s3335_s8, 4  ;;  %s2591_s15 = int_to_ptr.vmem [resolvable:$true] %s2590_s15 }
0x13bc   :  { %2455 = vadd.xlane.f32.xlu0 %v2454_v9  ;;  %v2451_v43 = vsel %vm441_vm2, %v2449_v14, 0.0  ;;  %s3296_s12 = scalar_lea.vmem %s2591_s15, 256  ;;  %p3301_p3 = scmp.lt.s32.totalorder %s2591_s15, %s2591_s15 }
0x13bd   :  { %2452 = vadd.xlane.f32.xlu1 %v2451_v43  ;;  %3142 = vmatprep.subr.bf16.mxu0 %v3141_v1  ;;  %p3297_p2 = scmp.ne.s32.totalorder %s2591_s15, %s3296_s12  ;;  %p3302_p4 = scmp.lt.s32.totalorder %s3296_s12, %s3296_s12 }
0x13be   :  { %3144 = vmatpush3.bf16.msra.mxu0 %v3141_v1 }
0x13bf   :  { %3146 = vmatprep.subr.bf16.mxu0 %v3145_v25  ;;  %p3303_p5 = por %p3302_p4, %p3301_p3 }
0x13c1   :  { %p3304_p6 = pnand %p3303_p5, %p3297_p2 }
0x13c2   :  { %3148 = vmatpush3.bf16.msra.mxu0 %v3145_v25 }
0x13c3   :  { %3150 = vmatprep.subr.bf16.mxu0 %v3149_v15 }
0x13c6   :  { %3152 = vmatpush3.bf16.msra.mxu0 %v3149_v15 }
0x13c7   :  { %3154 = vmatprep.subr.bf16.mxu0 %v3153_v37 }
0x13ca   :  { %3156 = vmatpush3.bf16.msra.mxu0 %v3153_v37 }
0x1449   :  { %v2456_v10 = vpop.xlane.xlu0 %2455 }
0x144a   :  { %v2459_v24 = vmul.f32 0.015625, %v2456_v10  ;;  %v2453_v44 = vpop.xlane.xlu1 %2452 }
0x144b   :  { %v2458_v54 = vmul.f32 0.015625, %v2453_v44 }
0x144c   :  { %v2461_v58 = vsub.f32 %v2450_v17, %v2459_v24 }
0x144d   :  { %v2460_v11 = vsub.f32 %v2449_v14, %v2458_v54 }
0x144e   :  { %v2463_v47 = vmul.f32 %v2461_v58, %v2461_v58 }
0x144f   :  { %v2462_v55 = vmul.f32 %v2460_v11, %v2460_v11 }
0x1450   :  { %v2467_v30 = vsel %vm441_vm2, %v2463_v47, 0.0 }
0x1451   :  { %2468 = vadd.xlane.f32.xlu0 %v2467_v30  ;;  %v2464_v50 = vsel %vm441_vm2, %v2462_v55, 0.0 }
0x1452   :  { %2465 = vadd.xlane.f32.xlu1 %v2464_v50 }
0x14de   :  { %v2469_v60 = vpop.xlane.xlu0 %2468 }
0x14df   :  { %v2471_v34 = vmul.f32 0.015625, %v2469_v60  ;;  %v2466_v38 = vpop.xlane.xlu1 %2465 }
0x14e0   :  { %v2470_v22 = vmul.f32 0.015625, %v2466_v38 }
0x14e1   :  { %v2473_v0 = vadd.f32 1e-05, %v2471_v34 }
0x14e2   :  { %v2472_v2 = vadd.f32 1e-05, %v2470_v22 }
0x14e3   :  { %3243 = vrsqrt.f32 %v2473_v0 }
0x14e4   :  { %3245 = vrsqrt.f32 %v2472_v2 }
0x14ed   :  { %v3244_v62 = vpop.eup %3243 }
0x14ee   :  { %v3246_v4 = vpop.eup %3245  ;;  %v2477_v39 = vmul.f32 %v3244_v62, %v2461_v58 }
0x14ef   :  { %v2476_v26 = vmul.f32 %v3246_v4, %v2460_v11 }
0x14f0   :  { %v2483_v27 = vmul.f32 %v2481_v29, %v2477_v39 }
0x14f1   :  { %v2482_v18 = vmul.f32 %v2481_v29, %v2476_v26 }
0x14f2   :  { %v2489_v48 = vadd.f32 %v2487_v61, %v2483_v27 }
0x14f3   :  { %v2488_v7 = vadd.f32 %v2487_v61, %v2482_v18 }
0x14f5   :  { %2998 = vmatprep.mubr.msk.f32.mxu0 %vm441_vm2, %v2488_v7 }
0x14f6   :  { %2999 = vmatmul.mubr.msk.f32.vlgmr.msra.gmra.mrb[14].mxu0 %vm441_vm2, %v2489_v48 }
0x15c9   :  { %v3000_v33 = vpop.f32.mrb[14].mxu0 }
0x15ca   :  { %v2580_v12 = vadd.f32 %v3000_v33, %v2501_v23  ;;  %v2574_v8 = vpop.f32.mrb[15].mxu0 }
0x15cb   :  { %v2575_v45 = vadd.f32 %v2574_v8, %v2501_v23 }
0x15cc   :  { %2584 = vst.msk [vmem:[#allocation7 + $0x8] sm:$0xff] %vm102_vm0, %v2580_v12 }
0x15cd   :  { %2583 = vst.msk [vmem:[#allocation7] sm:$0xff] %vm102_vm0, %v2575_v45 }
0x15ce   :  { %3307 = shalt.err (!%p3304_p6)
}
0x15cf   :  { %s3308_s26 = scalar_lea.hbm %s4610_s16, 256 }
0x15d0   :  { %p3309_p7 = scmp.ne.s32.totalorder %s4610_s16, %s3308_s26  ;;  %p3312_p8 = scmp.lt.u32.totalorder %s3308_s26, %s4610_s16 }
0x15d2   :  { %p3314_p9 = pnand %p3312_p8, %p3309_p7 }
0x15d4   :  { %3317 = shalt.err (!%p3314_p9)
}
0x15d5   :  { %s3336_s14 = smov 128  }
0x15d6   :  { %2596 = dma.vmem_to_hbm [thread:$0]  %s2591_s15, 256, %s4610_s16, [#allocation4], %s3336_s14, %s3336_s14, %s3333_s25  }
0x15d7   :  { %3322 = dma.done.wait [#allocation4], 256  }
0x15d8   :  { %3323 = vsyncadd [#allocation4], 4294967040 }
0x15d9   :  { %2600 = vsyncpa [#allocation3], 1 }
0x15da   :  { %2601 = vsyncpa [#allocation6], 1 }
0x15db   :  { %2602 = vsyncpa [#allocation4], 1 }

</bundles_post_ra>
